<compile_context>
chip_gen: v7x
topology: tpu7x:2x2x1
jax: 0.10.0
libtpu: 0.0.40
codegen_flags: <defaults>
</compile_context>

<pallas_src>
import functools
import math

import jax
import jax.numpy as jnp
from jax.experimental import pallas as pl
from jax.experimental.pallas import tpu as pltpu


# ----------------------------- kernel helpers ---------------------------------

def _layernorm(x, gamma, beta, eps=1e-12):
    # f32 statistics (eps=1e-12 would underflow in bf16).
    mu = jnp.mean(x, axis=-1, keepdims=True)
    var = jnp.mean((x - mu) * (x - mu), axis=-1, keepdims=True)
    return (x - mu) * jax.lax.rsqrt(var + eps) * gamma + beta


def _gelu(x):
    # tanh-approximate GELU, computed in f32.
    # TODO(synk): exact erf-based GELU if bit-exactness with torch.nn.GELU is needed.
    c = 0.7978845608028654  # sqrt(2/pi)
    return 0.5 * x * (1.0 + jnp.tanh(c * (x + 0.044715 * x * x * x)))


# ------------------------- fused encoder-stack kernel --------------------------

def encoder_stack_kernel(
    x_ref,
    wqkv_ref, bqkv_ref, wo_ref, bo_ref, ln1g_ref, ln1b_ref,
    wi_ref, bi_ref, w2_ref, b2_ref, ln2g_ref, ln2b_ref,
    out_ref,
    act_ref,
    *, batch, seq_len, hidden, num_heads,
):
    layer = pl.program_id(0)
    head_dim = hidden // num_heads
    scale = 1.0 / math.sqrt(head_dim)
    bl = batch * seq_len

    # Layer 0: load the input activations into the resident VMEM scratch.
    @pl.when(layer == 0)
    def _():
        act_ref[...] = x_ref[...].astype(jnp.float32)

    x = act_ref[...]                       # (B*L, H) f32, resident across layers
    xb = x.astype(jnp.bfloat16)

    # ---- fused QKV projection (one MXU matmul, K=H, N=3H) ----
    qkv = jnp.dot(xb, wqkv_ref[0], preferred_element_type=jnp.float32) + bqkv_ref[0]

    # ---- multi-head self-attention (no mask: ext_vmasks is None) ----
    wo = wo_ref[0]                         # (H, H) bf16
    attn = None
    for h in range(num_heads):             # small static loop; batch handled by einsum
        lo = h * head_dim
        qh = qkv[:, lo:lo + head_dim].reshape(batch, seq_len, head_dim).astype(jnp.bfloat16)
        kh = qkv[:, hidden + lo:hidden + lo + head_dim].reshape(
            batch, seq_len, head_dim).astype(jnp.bfloat16)
        vh = qkv[:, 2 * hidden + lo:2 * hidden + lo + head_dim].reshape(
            batch, seq_len, head_dim).astype(jnp.bfloat16)

        s = jnp.einsum('bqd,bkd->bqk', qh, kh,
                       preferred_element_type=jnp.float32) * scale      # (B, L, L) f32
        s = s - jnp.max(s, axis=-1, keepdims=True)
        p = jnp.exp(s)
        p = p * pl.reciprocal(jnp.sum(p, axis=-1, keepdims=True), approx=True)

        ctx = jnp.einsum('bqk,bkd->bqd', p.astype(jnp.bfloat16), vh,
                         preferred_element_type=jnp.float32)            # (B, L, hd)
        ctx2 = ctx.reshape(bl, head_dim).astype(jnp.bfloat16)

        # accumulate output projection per head -> no lane-axis concatenate needed
        part = jnp.dot(ctx2, wo[lo:lo + head_dim, :],
                       preferred_element_type=jnp.float32)
        attn = part if attn is None else attn + part
    attn = attn + bo_ref[0]

    # add & norm
    h1 = _layernorm(attn + x, ln1g_ref[0], ln1b_ref[0])

    # ---- feed-forward ----
    inter = _gelu(jnp.dot(h1.astype(jnp.bfloat16), wi_ref[0],
                          preferred_element_type=jnp.float32) + bi_ref[0])
    ffn = jnp.dot(inter.astype(jnp.bfloat16), w2_ref[0],
                  preferred_element_type=jnp.float32) + b2_ref[0]
    h2 = _layernorm(ffn + h1, ln2g_ref[0], ln2b_ref[0])

    # keep activations resident for the next layer
    act_ref[...] = h2

    @pl.when(layer == pl.num_programs(0) - 1)
    def _():
        out_ref[...] = h2.astype(out_ref.dtype)


# ------------------------------ wrapper / specs --------------------------------

def transformer_video_encoder(x, stacked, *, num_heads):
    """x: (B, L, H) f32. stacked: dict of per-layer-stacked weights (leading layer axis)."""
    B, L, H = x.shape
    NL = stacked["wqkv"].shape[0]
    I = stacked["wi"].shape[-1]
    BL = B * L
    x2 = x.reshape(BL, H)                    # fold batch into the matmul M dimension

    names = ["wqkv", "bqkv", "wo", "bo", "ln1_g", "ln1_b",
             "wi", "bi", "w2", "b2", "ln2_g", "ln2_b"]
    weights = [stacked[n] for n in names]

    def wspec(w):
        zeros = (0,) * (w.ndim - 1)
        return pl.BlockSpec((1,) + tuple(w.shape[1:]), lambda l, z=zeros: (l,) + z)

    w_specs = [wspec(w) for w in weights]
    x_spec = pl.BlockSpec((BL, H), lambda l: (0, 0))
    out_spec = pl.BlockSpec((BL, H), lambda l: (0, 0))   # lane-dense (H multiple of 128)

    kernel = functools.partial(
        encoder_stack_kernel, batch=B, seq_len=L, hidden=H, num_heads=num_heads)

    # cost estimate: QKV + scores + ctx + out-proj + FFN
    flops = 2 * NL * BL * (4 * H * H + 2 * L * H + 2 * H * I)
    transcendentals = NL * (B * num_heads * L * L + BL * I + 2 * BL)
    bytes_accessed = int(
        2 * x2.size * x2.dtype.itemsize
        + sum(int(w.size) * w.dtype.itemsize for w in weights))

    # VMEM budget: double-buffered per-layer weights + activations (+ slack), clamped to a
    # range that is safe on v5e/v6e (128 MiB) and v7x (64 MiB physical).
    per_layer_w_bytes = sum(
        int(math.prod(w.shape[1:])) * w.dtype.itemsize for w in weights)
    vmem_needed = 2 * per_layer_w_bytes + 6 * BL * H * 4
    vmem_limit = int(max(32 * 2**20, min(64 * 2**20, 2 * vmem_needed)))

    out = pl.pallas_call(
        kernel,
        out_shape=jax.ShapeDtypeStruct((BL, H), x.dtype),
        grid_spec=pltpu.PrefetchScalarGridSpec(
            num_scalar_prefetch=0,
            grid=(NL,),                                   # layers are sequential
            in_specs=[x_spec] + w_specs,
            out_specs=out_spec,
            scratch_shapes=[pltpu.VMEM((BL, H), jnp.float32)],   # resident activations
        ),
        compiler_params=pltpu.CompilerParams(
            dimension_semantics=("arbitrary",),
            vmem_limit_bytes=vmem_limit,
        ),
        cost_estimate=pl.CostEstimate(
            flops=flops, transcendentals=transcendentals, bytes_accessed=bytes_accessed),
    )(x2, *weights)

    return out.reshape(B, L, H)


# -------------------------- parameter init / stacking --------------------------

def init_layer_params(key, hidden, intermediate):
    ks = jax.random.split(key, 6)
    std = 0.02

    def dense(k, fan_in, fan_out):
        return jax.random.normal(k, (fan_in, fan_out), jnp.float32) * std

    wq = dense(ks[0], hidden, hidden)
    wk = dense(ks[1], hidden, hidden)
    wv = dense(ks[2], hidden, hidden)
    return {
        "wqkv": jnp.concatenate([wq, wk, wv], axis=1),          # (H, 3H)
        "bqkv": jnp.zeros((1, 3 * hidden), jnp.float32),
        "wo": dense(ks[3], hidden, hidden),
        "bo": jnp.zeros((1, hidden), jnp.float32),
        "ln1_g": jnp.ones((1, hidden), jnp.float32),
        "ln1_b": jnp.zeros((1, hidden), jnp.float32),
        "wi": dense(ks[4], hidden, intermediate),
        "bi": jnp.zeros((1, intermediate), jnp.float32),
        "w2": dense(ks[5], intermediate, hidden),
        "b2": jnp.zeros((1, hidden), jnp.float32),
        "ln2_g": jnp.ones((1, hidden), jnp.float32),
        "ln2_b": jnp.zeros((1, hidden), jnp.float32),
    }


def stack_layer_params(params_list):
    """Stack per-layer params along a leading layer axis; dense matrices -> bf16."""
    bf16_names = ("wqkv", "wo", "wi", "w2")
    stacked = {}
    for name in params_list[0]:
        arr = jnp.stack([p[name] for p in params_list], axis=0)
        if name in bf16_names:
            arr = arr.astype(jnp.bfloat16)
        stacked[name] = arr
    return stacked


# ------------------------- TransformerVideoEncoder fwd ------------------------

def transformer_video_encoder_forward(batched_inputs, stacked_params, *, num_heads):
    """Mirrors TransformerVideoEncoder.forward with mode=None / 'v' (ext_vmasks=None)."""
    grid_feats = batched_inputs["ATT_FEATS_WO_MASK"]    # passed through unchanged
    global_feats = batched_inputs["ATT_FEATS"]
    global_feats = transformer_video_encoder(global_feats, stacked_params,
                                             num_heads=num_heads)
    return {"ATT_FEATS_WO_MASK": grid_feats, "ATT_FEATS": global_feats}


# ------------------------------------ main -------------------------------------

if __name__ == "__main__":
    B, L, H = 2, 8, 128          # batch, seq, hidden (H multiple of 128 -> lane-dense stores)
    NUM_HEADS = 4
    INTERMEDIATE = 256
    NUM_HIDDEN_LAYERS = 2

    key = jax.random.PRNGKey(0)
    k_grid, k_glob, k_params = jax.random.split(key, 3)

    grid_feats = jax.random.normal(k_grid, (B, L, H), jnp.float32)
    global_feats = jax.random.normal(k_glob, (B, L, H), jnp.float32)

    layer_keys = jax.random.split(k_params, NUM_HIDDEN_LAYERS)
    stacked_params = stack_layer_params(
        [init_layer_params(lk, H, INTERMEDIATE) for lk in layer_keys])

    batched_inputs = {
        "ATT_FEATS_WO_MASK": grid_feats,
        "ATT_FEATS": global_feats,
    }

    out = transformer_video_encoder_forward(
        batched_inputs, stacked_params, num_heads=NUM_HEADS)
    jax.block_until_ready(out["ATT_FEATS"])
    jax.block_until_ready(out["ATT_FEATS_WO_MASK"])

    assert out["ATT_FEATS"].shape == (B, L, H)
    assert out["ATT_FEATS_WO_MASK"].shape == (B, L, H)
    assert bool(jnp.isfinite(out["ATT_FEATS"]).all())
    print("KERNEL_OK")
</pallas_src>

<mosaic_0001>
module attributes {stable_mosaic.version = 11 : i64} {
  func.func @encoder_stack_kernel(%arg0: i32, %arg1: memref<16x128xf32, #tpu.memory_space<vmem>>, %arg2: memref<1x128x384xbf16, #tpu.memory_space<vmem>>, %arg3: memref<1x1x384xf32, #tpu.memory_space<vmem>>, %arg4: memref<1x128x128xbf16, #tpu.memory_space<vmem>>, %arg5: memref<1x1x128xf32, #tpu.memory_space<vmem>>, %arg6: memref<1x1x128xf32, #tpu.memory_space<vmem>>, %arg7: memref<1x1x128xf32, #tpu.memory_space<vmem>>, %arg8: memref<1x128x256xbf16, #tpu.memory_space<vmem>>, %arg9: memref<1x1x256xf32, #tpu.memory_space<vmem>>, %arg10: memref<1x256x128xbf16, #tpu.memory_space<vmem>>, %arg11: memref<1x1x128xf32, #tpu.memory_space<vmem>>, %arg12: memref<1x1x128xf32, #tpu.memory_space<vmem>>, %arg13: memref<1x1x128xf32, #tpu.memory_space<vmem>>, %arg14: memref<16x128xf32, #tpu.memory_space<vmem>>, %arg15: memref<16x128xf32, #tpu.memory_space<vmem>>) attributes {dimension_semantics = [#tpu.dimension_semantics<arbitrary>], iteration_bounds = array<i64: 2>, scalar_prefetch = 0 : i64, scratch_operands = 1 : i64, tpu.core_type = #tpu.core_type<tc>, window_params = [{pipeline_mode = #tpu.pipeline_mode<synchronous>, transform_indices = @transform_0, window_bounds = array<i64: 16, 128>}, {transform_indices = @transform_1, window_bounds = array<i64: 1, 128, 384>}, {transform_indices = @transform_2, window_bounds = array<i64: 1, 1, 384>}, {transform_indices = @transform_3, window_bounds = array<i64: 1, 128, 128>}, {transform_indices = @transform_4, window_bounds = array<i64: 1, 1, 128>}, {transform_indices = @transform_5, window_bounds = array<i64: 1, 1, 128>}, {transform_indices = @transform_6, window_bounds = array<i64: 1, 1, 128>}, {transform_indices = @transform_7, window_bounds = array<i64: 1, 128, 256>}, {transform_indices = @transform_8, window_bounds = array<i64: 1, 1, 256>}, {transform_indices = @transform_9, window_bounds = array<i64: 1, 256, 128>}, {transform_indices = @transform_10, window_bounds = array<i64: 1, 1, 128>}, {transform_indices = @transform_11, window_bounds = array<i64: 1, 1, 128>}, {transform_indices = @transform_12, window_bounds = array<i64: 1, 1, 128>}, {pipeline_mode = #tpu.pipeline_mode<synchronous>, transform_indices = @transform_13, window_bounds = array<i64: 16, 128>}]} {
    %c0_i32 = arith.constant 0 : i32
    %0 = arith.cmpi eq, %arg0, %c0_i32 : i32
    %1 = arith.extui %0 : i1 to i32
    %c0_i32_0 = arith.constant 0 : i32
    %2 = arith.cmpi ne, %1, %c0_i32_0 : i32
    scf.if %2 {
      %c0_81 = arith.constant 0 : index
      %c0_82 = arith.constant 0 : index
      %224 = vector.load %arg1[%c0_81, %c0_82] : memref<16x128xf32, #tpu.memory_space<vmem>>, vector<16x128xf32>
      %c0_83 = arith.constant 0 : index
      %c0_84 = arith.constant 0 : index
      %225 = vector.load %arg15[%c0_83, %c0_84] : memref<16x128xf32, #tpu.memory_space<vmem>>, vector<16x128xf32>
      tpu.vector_store %arg15[%c0_83, %c0_84], %224 {strides = array<i32>} : memref<16x128xf32, #tpu.memory_space<vmem>>, vector<16x128xf32>,
    } else {
    }
    %c0 = arith.constant 0 : index
    %c0_1 = arith.constant 0 : index
    %3 = vector.load %arg15[%c0, %c0_1] : memref<16x128xf32, #tpu.memory_space<vmem>>, vector<16x128xf32>
    %4 = arith.truncf %3 : vector<16x128xf32> to vector<16x128xbf16>
    %c0_2 = arith.constant 0 : index
    %c0_3 = arith.constant 0 : index
    %c0_4 = arith.constant 0 : index
    %5 = vector.load %arg2[%c0_2, %c0_3, %c0_4] : memref<1x128x384xbf16, #tpu.memory_space<vmem>>, vector<1x128x384xbf16>
    %6 = vector.shape_cast %5 : vector<1x128x384xbf16> to vector<128x384xbf16>
    %cst = arith.constant dense<0.000000e+00> : vector<16x384xf32>
    %7 = tpu.matmul %4, %6, %cst {dimension_numbers = #tpu.dot_dimension_numbers<[1], [0], [0], [1], [0, 0, 1, 1], [], []>} : vector<16x128xbf16>, vector<128x384xbf16>, vector<16x384xf32> -> vector<16x384xf32>
    %c0_5 = arith.constant 0 : index
    %c0_6 = arith.constant 0 : index
    %c0_7 = arith.constant 0 : index
    %8 = vector.load %arg3[%c0_5, %c0_6, %c0_7] : memref<1x1x384xf32, #tpu.memory_space<vmem>>, vector<1x1x384xf32>
    %9 = vector.shape_cast %8 : vector<1x1x384xf32> to vector<1x384xf32>
    %10 = vector.broadcast %9 : vector<1x384xf32> to vector<16x384xf32>
    %11 = arith.addf %7, %10 : vector<16x384xf32>
    %c0_8 = arith.constant 0 : index
    %c0_9 = arith.constant 0 : index
    %c0_10 = arith.constant 0 : index
    %12 = vector.load %arg4[%c0_8, %c0_9, %c0_10] : memref<1x128x128xbf16, #tpu.memory_space<vmem>>, vector<1x128x128xbf16>
    %13 = vector.shape_cast %12 : vector<1x128x128xbf16> to vector<128x128xbf16>
    %14 = vector.extract_strided_slice %11 {offsets = [0, 0], sizes = [16, 32], strides = [1, 1]} : vector<16x384xf32> to vector<16x32xf32>
    %15 = vector.shape_cast %14 : vector<16x32xf32> to vector<2x8x32xf32>
    %16 = arith.truncf %15 : vector<2x8x32xf32> to vector<2x8x32xbf16>
    %17 = vector.extract_strided_slice %11 {offsets = [0, 128], sizes = [16, 32], strides = [1, 1]} : vector<16x384xf32> to vector<16x32xf32>
    %18 = vector.shape_cast %17 : vector<16x32xf32> to vector<2x8x32xf32>
    %19 = arith.truncf %18 : vector<2x8x32xf32> to vector<2x8x32xbf16>
    %20 = vector.extract_strided_slice %11 {offsets = [0, 256], sizes = [16, 32], strides = [1, 1]} : vector<16x384xf32> to vector<16x32xf32>
    %21 = vector.shape_cast %20 : vector<16x32xf32> to vector<2x8x32xf32>
    %22 = arith.truncf %21 : vector<2x8x32xf32> to vector<2x8x32xbf16>
    "tpu.trace_start"() <{level = 10 : i32, message = "bqd,bkd->bqk"}> : () -> ()
    %cst_11 = arith.constant dense<0.000000e+00> : vector<2x8x8xf32>
    %23 = tpu.matmul %16, %19, %cst_11 {dimension_numbers = #tpu.dot_dimension_numbers<[2], [2], [1], [1], [0, 0, 0, 1, 1, 1], [0], [0]>} : vector<2x8x32xbf16>, vector<2x8x32xbf16>, vector<2x8x8xf32> -> vector<2x8x8xf32>
    "tpu.trace_stop"() : () -> ()
    %cst_12 = arith.constant 0.176776692 : f32
    %24 = vector.broadcast %cst_12 : f32 to vector<2x8x8xf32>
    %25 = arith.mulf %23, %24 : vector<2x8x8xf32>
    %cst_13 = arith.constant dense<0xFF800000> : vector<2x8xf32>
    %26 = vector.multi_reduction <maximumf>, %25, %cst_13 [2] : vector<2x8x8xf32> to vector<2x8xf32>
    %27 = vector.shape_cast %26 : vector<2x8xf32> to vector<2x8x1xf32>
    %28 = vector.broadcast %27 : vector<2x8x1xf32> to vector<2x8x8xf32>
    %29 = arith.subf %25, %28 : vector<2x8x8xf32>
    %30 = math.exp %29 : vector<2x8x8xf32>
    %cst_14 = arith.constant dense<0.000000e+00> : vector<2x8xf32>
    %31 = vector.multi_reduction <add>, %30, %cst_14 [2] : vector<2x8x8xf32> to vector<2x8xf32>
    %32 = vector.shape_cast %31 : vector<2x8xf32> to vector<2x8x1xf32>
    %33 = tpu.reciprocal %32 {approx = true} : vector<2x8x1xf32> -> vector<2x8x1xf32>
    %34 = vector.broadcast %33 : vector<2x8x1xf32> to vector<2x8x8xf32>
    %35 = arith.mulf %30, %34 : vector<2x8x8xf32>
    %36 = arith.truncf %35 : vector<2x8x8xf32> to vector<2x8x8xbf16>
    "tpu.trace_start"() <{level = 10 : i32, message = "bqk,bkd->bqd"}> : () -> ()
    %cst_15 = arith.constant dense<0.000000e+00> : vector<2x8x32xf32>
    %37 = tpu.matmul %36, %22, %cst_15 {dimension_numbers = #tpu.dot_dimension_numbers<[2], [1], [1], [2], [0, 0, 0, 1, 1, 2], [0], [0]>} : vector<2x8x8xbf16>, vector<2x8x32xbf16>, vector<2x8x32xf32> -> vector<2x8x32xf32>
    "tpu.trace_stop"() : () -> ()
    %38 = vector.shape_cast %37 : vector<2x8x32xf32> to vector<16x32xf32>
    %39 = arith.truncf %38 : vector<16x32xf32> to vector<16x32xbf16>
    %40 = vector.extract_strided_slice %13 {offsets = [0, 0], sizes = [32, 128], strides = [1, 1]} : vector<128x128xbf16> to vector<32x128xbf16>
    %cst_16 = arith.constant dense<0.000000e+00> : vector<16x128xf32>
    %41 = tpu.matmul %39, %40, %cst_16 {dimension_numbers = #tpu.dot_dimension_numbers<[1], [0], [0], [1], [0, 0, 1, 1], [], []>} : vector<16x32xbf16>, vector<32x128xbf16>, vector<16x128xf32> -> vector<16x128xf32>
    %42 = vector.extract_strided_slice %11 {offsets = [0, 32], sizes = [16, 32], strides = [1, 1]} : vector<16x384xf32> to vector<16x32xf32>
    %43 = vector.shape_cast %42 : vector<16x32xf32> to vector<2x8x32xf32>
    %44 = arith.truncf %43 : vector<2x8x32xf32> to vector<2x8x32xbf16>
    %45 = vector.extract_strided_slice %11 {offsets = [0, 160], sizes = [16, 32], strides = [1, 1]} : vector<16x384xf32> to vector<16x32xf32>
    %46 = vector.shape_cast %45 : vector<16x32xf32> to vector<2x8x32xf32>
    %47 = arith.truncf %46 : vector<2x8x32xf32> to vector<2x8x32xbf16>
    %48 = vector.extract_strided_slice %11 {offsets = [0, 288], sizes = [16, 32], strides = [1, 1]} : vector<16x384xf32> to vector<16x32xf32>
    %49 = vector.shape_cast %48 : vector<16x32xf32> to vector<2x8x32xf32>
    %50 = arith.truncf %49 : vector<2x8x32xf32> to vector<2x8x32xbf16>
    "tpu.trace_start"() <{level = 10 : i32, message = "bqd,bkd->bqk"}> : () -> ()
    %cst_17 = arith.constant dense<0.000000e+00> : vector<2x8x8xf32>
    %51 = tpu.matmul %44, %47, %cst_17 {dimension_numbers = #tpu.dot_dimension_numbers<[2], [2], [1], [1], [0, 0, 0, 1, 1, 1], [0], [0]>} : vector<2x8x32xbf16>, vector<2x8x32xbf16>, vector<2x8x8xf32> -> vector<2x8x8xf32>
    "tpu.trace_stop"() : () -> ()
    %cst_18 = arith.constant 0.176776692 : f32
    %52 = vector.broadcast %cst_18 : f32 to vector<2x8x8xf32>
    %53 = arith.mulf %51, %52 : vector<2x8x8xf32>
    %cst_19 = arith.constant dense<0xFF800000> : vector<2x8xf32>
    %54 = vector.multi_reduction <maximumf>, %53, %cst_19 [2] : vector<2x8x8xf32> to vector<2x8xf32>
    %55 = vector.shape_cast %54 : vector<2x8xf32> to vector<2x8x1xf32>
    %56 = vector.broadcast %55 : vector<2x8x1xf32> to vector<2x8x8xf32>
    %57 = arith.subf %53, %56 : vector<2x8x8xf32>
    %58 = math.exp %57 : vector<2x8x8xf32>
    %cst_20 = arith.constant dense<0.000000e+00> : vector<2x8xf32>
    %59 = vector.multi_reduction <add>, %58, %cst_20 [2] : vector<2x8x8xf32> to vector<2x8xf32>
    %60 = vector.shape_cast %59 : vector<2x8xf32> to vector<2x8x1xf32>
    %61 = tpu.reciprocal %60 {approx = true} : vector<2x8x1xf32> -> vector<2x8x1xf32>
    %62 = vector.broadcast %61 : vector<2x8x1xf32> to vector<2x8x8xf32>
    %63 = arith.mulf %58, %62 : vector<2x8x8xf32>
    %64 = arith.truncf %63 : vector<2x8x8xf32> to vector<2x8x8xbf16>
    "tpu.trace_start"() <{level = 10 : i32, message = "bqk,bkd->bqd"}> : () -> ()
    %cst_21 = arith.constant dense<0.000000e+00> : vector<2x8x32xf32>
    %65 = tpu.matmul %64, %50, %cst_21 {dimension_numbers = #tpu.dot_dimension_numbers<[2], [1], [1], [2], [0, 0, 0, 1, 1, 2], [0], [0]>} : vector<2x8x8xbf16>, vector<2x8x32xbf16>, vector<2x8x32xf32> -> vector<2x8x32xf32>
    "tpu.trace_stop"() : () -> ()
    %66 = vector.shape_cast %65 : vector<2x8x32xf32> to vector<16x32xf32>
    %67 = arith.truncf %66 : vector<16x32xf32> to vector<16x32xbf16>
    %68 = vector.extract_strided_slice %13 {offsets = [32, 0], sizes = [32, 128], strides = [1, 1]} : vector<128x128xbf16> to vector<32x128xbf16>
    %cst_22 = arith.constant dense<0.000000e+00> : vector<16x128xf32>
    %69 = tpu.matmul %67, %68, %cst_22 {dimension_numbers = #tpu.dot_dimension_numbers<[1], [0], [0], [1], [0, 0, 1, 1], [], []>} : vector<16x32xbf16>, vector<32x128xbf16>, vector<16x128xf32> -> vector<16x128xf32>
    %70 = arith.addf %41, %69 : vector<16x128xf32>
    %71 = vector.extract_strided_slice %11 {offsets = [0, 64], sizes = [16, 32], strides = [1, 1]} : vector<16x384xf32> to vector<16x32xf32>
    %72 = vector.shape_cast %71 : vector<16x32xf32> to vector<2x8x32xf32>
    %73 = arith.truncf %72 : vector<2x8x32xf32> to vector<2x8x32xbf16>
    %74 = vector.extract_strided_slice %11 {offsets = [0, 192], sizes = [16, 32], strides = [1, 1]} : vector<16x384xf32> to vector<16x32xf32>
    %75 = vector.shape_cast %74 : vector<16x32xf32> to vector<2x8x32xf32>
    %76 = arith.truncf %75 : vector<2x8x32xf32> to vector<2x8x32xbf16>
    %77 = vector.extract_strided_slice %11 {offsets = [0, 320], sizes = [16, 32], strides = [1, 1]} : vector<16x384xf32> to vector<16x32xf32>
    %78 = vector.shape_cast %77 : vector<16x32xf32> to vector<2x8x32xf32>
    %79 = arith.truncf %78 : vector<2x8x32xf32> to vector<2x8x32xbf16>
    "tpu.trace_start"() <{level = 10 : i32, message = "bqd,bkd->bqk"}> : () -> ()
    %cst_23 = arith.constant dense<0.000000e+00> : vector<2x8x8xf32>
    %80 = tpu.matmul %73, %76, %cst_23 {dimension_numbers = #tpu.dot_dimension_numbers<[2], [2], [1], [1], [0, 0, 0, 1, 1, 1], [0], [0]>} : vector<2x8x32xbf16>, vector<2x8x32xbf16>, vector<2x8x8xf32> -> vector<2x8x8xf32>
    "tpu.trace_stop"() : () -> ()
    %cst_24 = arith.constant 0.176776692 : f32
    %81 = vector.broadcast %cst_24 : f32 to vector<2x8x8xf32>
    %82 = arith.mulf %80, %81 : vector<2x8x8xf32>
    %cst_25 = arith.constant dense<0xFF800000> : vector<2x8xf32>
    %83 = vector.multi_reduction <maximumf>, %82, %cst_25 [2] : vector<2x8x8xf32> to vector<2x8xf32>
    %84 = vector.shape_cast %83 : vector<2x8xf32> to vector<2x8x1xf32>
    %85 = vector.broadcast %84 : vector<2x8x1xf32> to vector<2x8x8xf32>
    %86 = arith.subf %82, %85 : vector<2x8x8xf32>
    %87 = math.exp %86 : vector<2x8x8xf32>
    %cst_26 = arith.constant dense<0.000000e+00> : vector<2x8xf32>
    %88 = vector.multi_reduction <add>, %87, %cst_26 [2] : vector<2x8x8xf32> to vector<2x8xf32>
    %89 = vector.shape_cast %88 : vector<2x8xf32> to vector<2x8x1xf32>
    %90 = tpu.reciprocal %89 {approx = true} : vector<2x8x1xf32> -> vector<2x8x1xf32>
    %91 = vector.broadcast %90 : vector<2x8x1xf32> to vector<2x8x8xf32>
    %92 = arith.mulf %87, %91 : vector<2x8x8xf32>
    %93 = arith.truncf %92 : vector<2x8x8xf32> to vector<2x8x8xbf16>
    "tpu.trace_start"() <{level = 10 : i32, message = "bqk,bkd->bqd"}> : () -> ()
    %cst_27 = arith.constant dense<0.000000e+00> : vector<2x8x32xf32>
    %94 = tpu.matmul %93, %79, %cst_27 {dimension_numbers = #tpu.dot_dimension_numbers<[2], [1], [1], [2], [0, 0, 0, 1, 1, 2], [0], [0]>} : vector<2x8x8xbf16>, vector<2x8x32xbf16>, vector<2x8x32xf32> -> vector<2x8x32xf32>
    "tpu.trace_stop"() : () -> ()
    %95 = vector.shape_cast %94 : vector<2x8x32xf32> to vector<16x32xf32>
    %96 = arith.truncf %95 : vector<16x32xf32> to vector<16x32xbf16>
    %97 = vector.extract_strided_slice %13 {offsets = [64, 0], sizes = [32, 128], strides = [1, 1]} : vector<128x128xbf16> to vector<32x128xbf16>
    %cst_28 = arith.constant dense<0.000000e+00> : vector<16x128xf32>
    %98 = tpu.matmul %96, %97, %cst_28 {dimension_numbers = #tpu.dot_dimension_numbers<[1], [0], [0], [1], [0, 0, 1, 1], [], []>} : vector<16x32xbf16>, vector<32x128xbf16>, vector<16x128xf32> -> vector<16x128xf32>
    %99 = arith.addf %70, %98 : vector<16x128xf32>
    %100 = vector.extract_strided_slice %11 {offsets = [0, 96], sizes = [16, 32], strides = [1, 1]} : vector<16x384xf32> to vector<16x32xf32>
    %101 = vector.shape_cast %100 : vector<16x32xf32> to vector<2x8x32xf32>
    %102 = arith.truncf %101 : vector<2x8x32xf32> to vector<2x8x32xbf16>
    %103 = vector.extract_strided_slice %11 {offsets = [0, 224], sizes = [16, 32], strides = [1, 1]} : vector<16x384xf32> to vector<16x32xf32>
    %104 = vector.shape_cast %103 : vector<16x32xf32> to vector<2x8x32xf32>
    %105 = arith.truncf %104 : vector<2x8x32xf32> to vector<2x8x32xbf16>
    %106 = vector.extract_strided_slice %11 {offsets = [0, 352], sizes = [16, 32], strides = [1, 1]} : vector<16x384xf32> to vector<16x32xf32>
    %107 = vector.shape_cast %106 : vector<16x32xf32> to vector<2x8x32xf32>
    %108 = arith.truncf %107 : vector<2x8x32xf32> to vector<2x8x32xbf16>
    "tpu.trace_start"() <{level = 10 : i32, message = "bqd,bkd->bqk"}> : () -> ()
    %cst_29 = arith.constant dense<0.000000e+00> : vector<2x8x8xf32>
    %109 = tpu.matmul %102, %105, %cst_29 {dimension_numbers = #tpu.dot_dimension_numbers<[2], [2], [1], [1], [0, 0, 0, 1, 1, 1], [0], [0]>} : vector<2x8x32xbf16>, vector<2x8x32xbf16>, vector<2x8x8xf32> -> vector<2x8x8xf32>
    "tpu.trace_stop"() : () -> ()
    %cst_30 = arith.constant 0.176776692 : f32
    %110 = vector.broadcast %cst_30 : f32 to vector<2x8x8xf32>
    %111 = arith.mulf %109, %110 : vector<2x8x8xf32>
    %cst_31 = arith.constant dense<0xFF800000> : vector<2x8xf32>
    %112 = vector.multi_reduction <maximumf>, %111, %cst_31 [2] : vector<2x8x8xf32> to vector<2x8xf32>
    %113 = vector.shape_cast %112 : vector<2x8xf32> to vector<2x8x1xf32>
    %114 = vector.broadcast %113 : vector<2x8x1xf32> to vector<2x8x8xf32>
    %115 = arith.subf %111, %114 : vector<2x8x8xf32>
    %116 = math.exp %115 : vector<2x8x8xf32>
    %cst_32 = arith.constant dense<0.000000e+00> : vector<2x8xf32>
    %117 = vector.multi_reduction <add>, %116, %cst_32 [2] : vector<2x8x8xf32> to vector<2x8xf32>
    %118 = vector.shape_cast %117 : vector<2x8xf32> to vector<2x8x1xf32>
    %119 = tpu.reciprocal %118 {approx = true} : vector<2x8x1xf32> -> vector<2x8x1xf32>
    %120 = vector.broadcast %119 : vector<2x8x1xf32> to vector<2x8x8xf32>
    %121 = arith.mulf %116, %120 : vector<2x8x8xf32>
    %122 = arith.truncf %121 : vector<2x8x8xf32> to vector<2x8x8xbf16>
    "tpu.trace_start"() <{level = 10 : i32, message = "bqk,bkd->bqd"}> : () -> ()
    %cst_33 = arith.constant dense<0.000000e+00> : vector<2x8x32xf32>
    %123 = tpu.matmul %122, %108, %cst_33 {dimension_numbers = #tpu.dot_dimension_numbers<[2], [1], [1], [2], [0, 0, 0, 1, 1, 2], [0], [0]>} : vector<2x8x8xbf16>, vector<2x8x32xbf16>, vector<2x8x32xf32> -> vector<2x8x32xf32>
    "tpu.trace_stop"() : () -> ()
    %124 = vector.shape_cast %123 : vector<2x8x32xf32> to vector<16x32xf32>
    %125 = arith.truncf %124 : vector<16x32xf32> to vector<16x32xbf16>
    %126 = vector.extract_strided_slice %13 {offsets = [96, 0], sizes = [32, 128], strides = [1, 1]} : vector<128x128xbf16> to vector<32x128xbf16>
    %cst_34 = arith.constant dense<0.000000e+00> : vector<16x128xf32>
    %127 = tpu.matmul %125, %126, %cst_34 {dimension_numbers = #tpu.dot_dimension_numbers<[1], [0], [0], [1], [0, 0, 1, 1], [], []>} : vector<16x32xbf16>, vector<32x128xbf16>, vector<16x128xf32> -> vector<16x128xf32>
    %128 = arith.addf %99, %127 : vector<16x128xf32>
    %c0_35 = arith.constant 0 : index
    %c0_36 = arith.constant 0 : index
    %c0_37 = arith.constant 0 : index
    %129 = vector.load %arg5[%c0_35, %c0_36, %c0_37] : memref<1x1x128xf32, #tpu.memory_space<vmem>>, vector<1x1x128xf32>
    %130 = vector.shape_cast %129 : vector<1x1x128xf32> to vector<1x128xf32>
    %131 = vector.broadcast %130 : vector<1x128xf32> to vector<16x128xf32>
    %132 = arith.addf %128, %131 : vector<16x128xf32>
    %133 = arith.addf %132, %3 : vector<16x128xf32>
    %c0_38 = arith.constant 0 : index
    %c0_39 = arith.constant 0 : index
    %c0_40 = arith.constant 0 : index
    %134 = vector.load %arg6[%c0_38, %c0_39, %c0_40] : memref<1x1x128xf32, #tpu.memory_space<vmem>>, vector<1x1x128xf32>
    %135 = vector.shape_cast %134 : vector<1x1x128xf32> to vector<1x128xf32>
    %c0_41 = arith.constant 0 : index
    %c0_42 = arith.constant 0 : index
    %c0_43 = arith.constant 0 : index
    %136 = vector.load %arg7[%c0_41, %c0_42, %c0_43] : memref<1x1x128xf32, #tpu.memory_space<vmem>>, vector<1x1x128xf32>
    %137 = vector.shape_cast %136 : vector<1x1x128xf32> to vector<1x128xf32>
    %cst_44 = arith.constant dense<0.000000e+00> : vector<16xf32>
    %138 = vector.multi_reduction <add>, %133, %cst_44 [1] : vector<16x128xf32> to vector<16xf32>
    %139 = vector.shape_cast %138 : vector<16xf32> to vector<16x1xf32>
    %cst_45 = arith.constant 1.280000e+02 : f32
    %140 = vector.broadcast %cst_45 : f32 to vector<16x1xf32>
    %141 = arith.divf %139, %140 : vector<16x1xf32>
    %142 = vector.broadcast %141 : vector<16x1xf32> to vector<16x128xf32>
    %143 = arith.subf %133, %142 : vector<16x128xf32>
    %144 = vector.broadcast %141 : vector<16x1xf32> to vector<16x128xf32>
    %145 = arith.subf %133, %144 : vector<16x128xf32>
    %146 = arith.mulf %143, %145 : vector<16x128xf32>
    %cst_46 = arith.constant dense<0.000000e+00> : vector<16xf32>
    %147 = vector.multi_reduction <add>, %146, %cst_46 [1] : vector<16x128xf32> to vector<16xf32>
    %148 = vector.shape_cast %147 : vector<16xf32> to vector<16x1xf32>
    %cst_47 = arith.constant 1.280000e+02 : f32
    %149 = vector.broadcast %cst_47 : f32 to vector<16x1xf32>
    %150 = arith.divf %148, %149 : vector<16x1xf32>
    %151 = vector.broadcast %141 : vector<16x1xf32> to vector<16x128xf32>
    %152 = arith.subf %133, %151 : vector<16x128xf32>
    %cst_48 = arith.constant 9.99999996E-13 : f32
    %153 = vector.broadcast %cst_48 : f32 to vector<16x1xf32>
    %154 = arith.addf %150, %153 : vector<16x1xf32>
    %155 = math.rsqrt %154 : vector<16x1xf32>
    %156 = vector.broadcast %155 : vector<16x1xf32> to vector<16x128xf32>
    %157 = arith.mulf %152, %156 : vector<16x128xf32>
    %158 = vector.broadcast %135 : vector<1x128xf32> to vector<16x128xf32>
    %159 = arith.mulf %157, %158 : vector<16x128xf32>
    %160 = vector.broadcast %137 : vector<1x128xf32> to vector<16x128xf32>
    %161 = arith.addf %159, %160 : vector<16x128xf32>
    %162 = arith.truncf %161 : vector<16x128xf32> to vector<16x128xbf16>
    %c0_49 = arith.constant 0 : index
    %c0_50 = arith.constant 0 : index
    %c0_51 = arith.constant 0 : index
    %163 = vector.load %arg8[%c0_49, %c0_50, %c0_51] : memref<1x128x256xbf16, #tpu.memory_space<vmem>>, vector<1x128x256xbf16>
    %164 = vector.shape_cast %163 : vector<1x128x256xbf16> to vector<128x256xbf16>
    %cst_52 = arith.constant dense<0.000000e+00> : vector<16x256xf32>
    %165 = tpu.matmul %162, %164, %cst_52 {dimension_numbers = #tpu.dot_dimension_numbers<[1], [0], [0], [1], [0, 0, 1, 1], [], []>} : vector<16x128xbf16>, vector<128x256xbf16>, vector<16x256xf32> -> vector<16x256xf32>
    %c0_53 = arith.constant 0 : index
    %c0_54 = arith.constant 0 : index
    %c0_55 = arith.constant 0 : index
    %166 = vector.load %arg9[%c0_53, %c0_54, %c0_55] : memref<1x1x256xf32, #tpu.memory_space<vmem>>, vector<1x1x256xf32>
    %167 = vector.shape_cast %166 : vector<1x1x256xf32> to vector<1x256xf32>
    %168 = vector.broadcast %167 : vector<1x256xf32> to vector<16x256xf32>
    %169 = arith.addf %165, %168 : vector<16x256xf32>
    %cst_56 = arith.constant 5.000000e-01 : f32
    %170 = vector.broadcast %cst_56 : f32 to vector<16x256xf32>
    %171 = arith.mulf %170, %169 : vector<16x256xf32>
    %cst_57 = arith.constant 4.471500e-02 : f32
    %172 = vector.broadcast %cst_57 : f32 to vector<16x256xf32>
    %173 = arith.mulf %172, %169 : vector<16x256xf32>
    %174 = arith.mulf %173, %169 : vector<16x256xf32>
    %175 = arith.mulf %174, %169 : vector<16x256xf32>
    %176 = arith.addf %169, %175 : vector<16x256xf32>
    %cst_58 = arith.constant 0.797884583 : f32
    %177 = vector.broadcast %cst_58 : f32 to vector<16x256xf32>
    %178 = arith.mulf %177, %176 : vector<16x256xf32>
    %179 = math.tanh %178 : vector<16x256xf32>
    %cst_59 = arith.constant 1.000000e+00 : f32
    %180 = vector.broadcast %cst_59 : f32 to vector<16x256xf32>
    %181 = arith.addf %180, %179 : vector<16x256xf32>
    %182 = arith.mulf %171, %181 : vector<16x256xf32>
    %183 = arith.truncf %182 : vector<16x256xf32> to vector<16x256xbf16>
    %c0_60 = arith.constant 0 : index
    %c0_61 = arith.constant 0 : index
    %c0_62 = arith.constant 0 : index
    %184 = vector.load %arg10[%c0_60, %c0_61, %c0_62] : memref<1x256x128xbf16, #tpu.memory_space<vmem>>, vector<1x256x128xbf16>
    %185 = vector.shape_cast %184 : vector<1x256x128xbf16> to vector<256x128xbf16>
    %cst_63 = arith.constant dense<0.000000e+00> : vector<16x128xf32>
    %186 = tpu.matmul %183, %185, %cst_63 {dimension_numbers = #tpu.dot_dimension_numbers<[1], [0], [0], [1], [0, 0, 1, 1], [], []>} : vector<16x256xbf16>, vector<256x128xbf16>, vector<16x128xf32> -> vector<16x128xf32>
    %c0_64 = arith.constant 0 : index
    %c0_65 = arith.constant 0 : index
    %c0_66 = arith.constant 0 : index
    %187 = vector.load %arg11[%c0_64, %c0_65, %c0_66] : memref<1x1x128xf32, #tpu.memory_space<vmem>>, vector<1x1x128xf32>
    %188 = vector.shape_cast %187 : vector<1x1x128xf32> to vector<1x128xf32>
    %189 = vector.broadcast %188 : vector<1x128xf32> to vector<16x128xf32>
    %190 = arith.addf %186, %189 : vector<16x128xf32>
    %191 = arith.addf %190, %161 : vector<16x128xf32>
    %c0_67 = arith.constant 0 : index
    %c0_68 = arith.constant 0 : index
    %c0_69 = arith.constant 0 : index
    %192 = vector.load %arg12[%c0_67, %c0_68, %c0_69] : memref<1x1x128xf32, #tpu.memory_space<vmem>>, vector<1x1x128xf32>
    %193 = vector.shape_cast %192 : vector<1x1x128xf32> to vector<1x128xf32>
    %c0_70 = arith.constant 0 : index
    %c0_71 = arith.constant 0 : index
    %c0_72 = arith.constant 0 : index
    %194 = vector.load %arg13[%c0_70, %c0_71, %c0_72] : memref<1x1x128xf32, #tpu.memory_space<vmem>>, vector<1x1x128xf32>
    %195 = vector.shape_cast %194 : vector<1x1x128xf32> to vector<1x128xf32>
    %cst_73 = arith.constant dense<0.000000e+00> : vector<16xf32>
    %196 = vector.multi_reduction <add>, %191, %cst_73 [1] : vector<16x128xf32> to vector<16xf32>
    %197 = vector.shape_cast %196 : vector<16xf32> to vector<16x1xf32>
    %cst_74 = arith.constant 1.280000e+02 : f32
    %198 = vector.broadcast %cst_74 : f32 to vector<16x1xf32>
    %199 = arith.divf %197, %198 : vector<16x1xf32>
    %200 = vector.broadcast %199 : vector<16x1xf32> to vector<16x128xf32>
    %201 = arith.subf %191, %200 : vector<16x128xf32>
    %202 = vector.broadcast %199 : vector<16x1xf32> to vector<16x128xf32>
    %203 = arith.subf %191, %202 : vector<16x128xf32>
    %204 = arith.mulf %201, %203 : vector<16x128xf32>
    %cst_75 = arith.constant dense<0.000000e+00> : vector<16xf32>
    %205 = vector.multi_reduction <add>, %204, %cst_75 [1] : vector<16x128xf32> to vector<16xf32>
    %206 = vector.shape_cast %205 : vector<16xf32> to vector<16x1xf32>
    %cst_76 = arith.constant 1.280000e+02 : f32
    %207 = vector.broadcast %cst_76 : f32 to vector<16x1xf32>
    %208 = arith.divf %206, %207 : vector<16x1xf32>
    %209 = vector.broadcast %199 : vector<16x1xf32> to vector<16x128xf32>
    %210 = arith.subf %191, %209 : vector<16x128xf32>
    %cst_77 = arith.constant 9.99999996E-13 : f32
    %211 = vector.broadcast %cst_77 : f32 to vector<16x1xf32>
    %212 = arith.addf %208, %211 : vector<16x1xf32>
    %213 = math.rsqrt %212 : vector<16x1xf32>
    %214 = vector.broadcast %213 : vector<16x1xf32> to vector<16x128xf32>
    %215 = arith.mulf %210, %214 : vector<16x128xf32>
    %216 = vector.broadcast %193 : vector<1x128xf32> to vector<16x128xf32>
    %217 = arith.mulf %215, %216 : vector<16x128xf32>
    %218 = vector.broadcast %195 : vector<1x128xf32> to vector<16x128xf32>
    %219 = arith.addf %217, %218 : vector<16x128xf32>
    %c0_78 = arith.constant 0 : index
    %c0_79 = arith.constant 0 : index
    %220 = vector.load %arg15[%c0_78, %c0_79] : memref<16x128xf32, #tpu.memory_space<vmem>>, vector<16x128xf32>
    tpu.vector_store %arg15[%c0_78, %c0_79], %219 {strides = array<i32>} : memref<16x128xf32, #tpu.memory_space<vmem>>, vector<16x128xf32>,
    %c1_i32 = arith.constant 1 : i32
    %221 = arith.cmpi eq, %arg0, %c1_i32 : i32
    %222 = arith.extui %221 : i1 to i32
    %c0_i32_80 = arith.constant 0 : i32
    %223 = arith.cmpi ne, %222, %c0_i32_80 : i32
    scf.if %223 {
      %c0_81 = arith.constant 0 : index
      %c0_82 = arith.constant 0 : index
      %224 = vector.load %arg14[%c0_81, %c0_82] : memref<16x128xf32, #tpu.memory_space<vmem>>, vector<16x128xf32>
      tpu.vector_store %arg14[%c0_81, %c0_82], %219 {strides = array<i32>} : memref<16x128xf32, #tpu.memory_space<vmem>>, vector<16x128xf32>,
    } else {
    }
    return
  }
  func.func @transform_0(%arg0: i32) -> (i32, i32) {
    %c0_i32 = arith.constant 0 : i32
    %c0_i32_0 = arith.constant 0 : i32
    %c0_i32_1 = arith.constant 0 : i32
    return %c0_i32, %c0_i32_0 : i32, i32
  }
  func.func @transform_1(%arg0: i32) -> (i32, i32, i32) {
    %c0_i32 = arith.constant 0 : i32
    %c0_i32_0 = arith.constant 0 : i32
    %c0_i32_1 = arith.constant 0 : i32
    return %arg0, %c0_i32, %c0_i32_0 : i32, i32, i32
  }
  func.func @transform_2(%arg0: i32) -> (i32, i32, i32) {
    %c0_i32 = arith.constant 0 : i32
    %c0_i32_0 = arith.constant 0 : i32
    %c0_i32_1 = arith.constant 0 : i32
    return %arg0, %c0_i32, %c0_i32_0 : i32, i32, i32
  }
  func.func @transform_3(%arg0: i32) -> (i32, i32, i32) {
    %c0_i32 = arith.constant 0 : i32
    %c0_i32_0 = arith.constant 0 : i32
    %c0_i32_1 = arith.constant 0 : i32
    return %arg0, %c0_i32, %c0_i32_0 : i32, i32, i32
  }
  func.func @transform_4(%arg0: i32) -> (i32, i32, i32) {
    %c0_i32 = arith.constant 0 : i32
    %c0_i32_0 = arith.constant 0 : i32
    %c0_i32_1 = arith.constant 0 : i32
    return %arg0, %c0_i32, %c0_i32_0 : i32, i32, i32
  }
  func.func @transform_5(%arg0: i32) -> (i32, i32, i32) {
    %c0_i32 = arith.constant 0 : i32
    %c0_i32_0 = arith.constant 0 : i32
    %c0_i32_1 = arith.constant 0 : i32
    return %arg0, %c0_i32, %c0_i32_0 : i32, i32, i32
  }
  func.func @transform_6(%arg0: i32) -> (i32, i32, i32) {
    %c0_i32 = arith.constant 0 : i32
    %c0_i32_0 = arith.constant 0 : i32
    %c0_i32_1 = arith.constant 0 : i32
    return %arg0, %c0_i32, %c0_i32_0 : i32, i32, i32
  }
  func.func @transform_7(%arg0: i32) -> (i32, i32, i32) {
    %c0_i32 = arith.constant 0 : i32
    %c0_i32_0 = arith.constant 0 : i32
    %c0_i32_1 = arith.constant 0 : i32
    return %arg0, %c0_i32, %c0_i32_0 : i32, i32, i32
  }
  func.func @transform_8(%arg0: i32) -> (i32, i32, i32) {
    %c0_i32 = arith.constant 0 : i32
    %c0_i32_0 = arith.constant 0 : i32
    %c0_i32_1 = arith.constant 0 : i32
    return %arg0, %c0_i32, %c0_i32_0 : i32, i32, i32
  }
  func.func @transform_9(%arg0: i32) -> (i32, i32, i32) {
    %c0_i32 = arith.constant 0 : i32
    %c0_i32_0 = arith.constant 0 : i32
    %c0_i32_1 = arith.constant 0 : i32
    return %arg0, %c0_i32, %c0_i32_0 : i32, i32, i32
  }
  func.func @transform_10(%arg0: i32) -> (i32, i32, i32) {
    %c0_i32 = arith.constant 0 : i32
    %c0_i32_0 = arith.constant 0 : i32
    %c0_i32_1 = arith.constant 0 : i32
    return %arg0, %c0_i32, %c0_i32_0 : i32, i32, i32
  }
  func.func @transform_11(%arg0: i32) -> (i32, i32, i32) {
    %c0_i32 = arith.constant 0 : i32
    %c0_i32_0 = arith.constant 0 : i32
    %c0_i32_1 = arith.constant 0 : i32
    return %arg0, %c0_i32, %c0_i32_0 : i32, i32, i32
  }
  func.func @transform_12(%arg0: i32) -> (i32, i32, i32) {
    %c0_i32 = arith.constant 0 : i32
    %c0_i32_0 = arith.constant 0 : i32
    %c0_i32_1 = arith.constant 0 : i32
    return %arg0, %c0_i32, %c0_i32_0 : i32, i32, i32
  }
  func.func @transform_13(%arg0: i32) -> (i32, i32) {
    %c0_i32 = arith.constant 0 : i32
    %c0_i32_0 = arith.constant 0 : i32
    %c0_i32_1 = arith.constant 0 : i32
    return %c0_i32, %c0_i32_0 : i32, i32
  }
}

</mosaic_0001>

<bundles_post_ra>
// kernel: tpu_custom_call.1
= control target key start
LH: loop header
LB: loop body
LE: loop exit
PB: predicated region body
PF: predicated region fallthrough
CT: control target
= control target key end

     0   :  { %s4323_s0 = inlined_call_operand.hbm [shape: f32[16,128], index: 0, kind: input, shape index: {}]   ;;  %s4324_s1 = inlined_call_operand.hbm [shape: bf16[2,128,384], index: 1, kind: input, shape index: {}]   ;;  %s4325_s2 = inlined_call_operand.vmem [shape: f32[2,1,384], index: 2, kind: input, shape index: {}]   ;;  %s4326_s3 = inlined_call_operand.hbm [shape: bf16[2,128,128], index: 3, kind: input, shape index: {}]   ;;  %s4327_s4 = inlined_call_operand.vmem [shape: f32[2,1,128], index: 4, kind: input, shape index: {}]   ;;  %s4328_s5 = inlined_call_operand.vmem [shape: f32[2,1,128], index: 5, kind: input, shape index: {}]   ;;  %s4329_s6 = inlined_call_operand.vmem [shape: f32[2,1,128], index: 6, kind: input, shape index: {}]   ;;  %s4330_s7 = inlined_call_operand.hbm [shape: bf16[2,128,256], index: 7, kind: input, shape index: {}]   ;;  %s4331_s8 = inlined_call_operand.vmem [shape: f32[2,1,256], index: 8, kind: input, shape index: {}]   ;;  %s4332_s9 = inlined_call_operand.hbm [shape: bf16[2,256,128], index: 9, kind: input, shape index: {}]   ;;  %s4333_s10 = inlined_call_operand.vmem [shape: f32[2,1,128], index: 10, kind: input, shape index: {}]   ;;  %s4334_s11 = inlined_call_operand.vmem [shape: f32[2,1,128], index: 11, kind: input, shape index: {}]   ;;  %s4335_s12 = inlined_call_operand.vmem [shape: f32[2,1,128], index: 12, kind: input, shape index: {}]   ;;  %s4336_s13 = inlined_call_operand.hbm [shape: f32[16,128], index: 13, kind: output, shape index: {}]  }
   0x1   :  { %4351 = sst [smem:[#allocation20_spill]] %s4323_s0 }
   0x2   :  { %4352 = sst [smem:[#allocation21_spill]] %s4324_s1 }
   0x3   :  { %4353 = sst [smem:[#allocation22_spill]] %s4326_s3 }
   0x4   :  { %4354 = sst [smem:[#allocation23_spill]] %s4330_s7 }
   0x5   :  { %4355 = sst [smem:[#allocation24_spill]] %s4331_s8 }
   0x6   :  { %4356 = sst [smem:[#allocation25_spill]] %s4332_s9 }
   0x7   :  { %4357 = sst [smem:[#allocation26_spill]] %s4333_s10 }
   0x8   :  { %4358 = sst [smem:[#allocation27_spill]] %s4334_s11 }
   0x9   :  { %4359 = sst [smem:[#allocation28_spill]] %s4335_s12 }
   0xa   :  { %4360 = sst [smem:[#allocation29_spill]] %s4336_s13 }
   0xb   :  { %18 = vsyncpa [#allocation4], 0 }
   0xc   :  { %19 = vsyncpa [#allocation7], 0 }
   0xd   :  { %21 = vsyncpa [#allocation7 + $0x1], 0 }
   0xe   :  { %22 = vsyncpa [#allocation10], 0 }
   0xf   :  { %24 = vsyncpa [#allocation10 + $0x1], 0 }
  0x10   :  { %25 = vsyncpa [#allocation5], 0  ;;  %s3658_s25 = smov 0   ;;  %s3660_s26 = smov 0  }
  0x11   :  { %s3662_s27 = smov 0   ;;  %s3664_s28 = smov 0  }
  0x12 LB: > { %4361 = sst [smem:[#allocation17_spill]] %s3562_s27  ;;  %s3679_s29 = sadd.s32 1, %s3566_s28   ;;  %s3566_s28 = sphi %s3664_s28, %s4395_s28   ;;  %s3562_s27 = sphi %s3662_s27, %s4397_s27   ;;  %s3558_s26 = sphi %s3660_s26, %s4399_s26   ;;  %s3554_s25 = sphi %s3658_s25, %s4398_s25  }
  0x13   : > { %4362 = sst [smem:[#allocation18_spill]] %s3679_s29  ;;  %s59_s30 = sadd.s32 1, %s3562_s27 }
  0x14   : > { %s56_s14 = ssub.s32 %s3566_s28, %s3679_s29  ;;  %p66_p0 = scmp.ne.s32.totalorder %s3562_s27, %s3558_s26 }
  0x15   : > { %p57_p1 = scmp.eq.s32.totalorder %s56_s14, 0  ;;  %p67_p2 = scmp.eq.s32.totalorder %s3566_s28, 0 }
  0x16   : > { %p3166_p3 = scmp.lt.s32.totalorder %s3566_s28, 2  ;;  %s4338_s16 = sand.u32 1, %s3566_s28  }
  0x17   : > { %s3689_s15 = scalar_select %p57_p1, %s3562_s27, %s59_s30  }
  0x18   : > { %p68_p4 = por %p67_p2, %p66_p0  ;;  %s3693_s17 = sand.u32 1, %s3562_s27  }
  0x19   : > { %4363 = sst [smem:[#allocation19_spill]] %s3689_s15  ;;  %s3128_s18 = smul.u32 192, %s3693_s17 }
  0x1a   : > { %p3696_p5 = pnand %p3166_p3, %p68_p4  ;;  %s3129_s20 = smul.u32 3072, %s3566_s28 }
  0x1b   : > { %s4365_s1 = sld [smem:[#allocation21_spill]]  ;;  %s420_s24 = scalar_lea.vmem [#allocation6], %s3128_s18 }
  0x1c   : > { %s4364_s19 = scalar_select %p3696_p5, 1, 0 }
  0x1d   : > { %s427_s30 = sshll.u32 %s420_s24, 4  ;;  %s3710_s14 = scalar_lea.sflag [#allocation7], %s4338_s16  ;;  %s3706_s30 = int_to_ptr.vmem [resolvable:$true] %s427_s30 }
  0x1e   : > { %p3716_p7 = pneg %p3696_p5 }
  0x20   : > { %s4366_s27 = scalar_select %p3716_p7, 1, 0 }
  0x21   : > { %s3704_s23 = scalar_lea.hbm %s4365_s1, %s3129_s20  ;;  %s3351_s18 = scalar_lea.hbm %s4365_s1, 6144 }
  0x22   : > { %s3346_s15 = scalar_lea.hbm %s3704_s23, 3072  ;;  %p3352_p10 = scmp.lt.u32.totalorder %s3704_s23, %s4365_s1 }
  0x23   : > { %p3347_p6 = scmp.ne.s32.totalorder %s3704_s23, %s3346_s15  ;;  %p3353_p11 = scmp.lt.u32.totalorder %s3351_s18, %s3346_s15 }
  0x24   : > { %p3355_p13 = scmp.lt.u32.totalorder %s3346_s15, %s3704_s23 }
  0x25   : > { %p3349_p8 = pnand %p3716_p7, %p3347_p6  ;;  %p3354_p12 = por %p3353_p11, %p3352_p10 }
  0x27   : > { %p3350_p9 = pneg %p3349_p8  ;;  %p3356_p0 = por %p3355_p13, %p3354_p12 }
  0x29   : > { %p3357_p1 = pnand %p3356_p0, %p3350_p9 }
  0x2b   : > { %3360 = shalt.err (!%p3357_p1)
}
  0x2c   : > { %s3361_s16 = scalar_lea.vmem %s3706_s30, 3072  ;;  %s3568_s20 = smov [#allocation6]  }
  0x2d   : > { %p3362_p2 = scmp.ne.s32.totalorder %s3706_s30, %s3361_s16  ;;  %s3366_s21 = sshll.u32 %s3568_s20, 4  ;;  %s3367_s21 = int_to_ptr.vmem [resolvable:$false] %s3366_s21 }
  0x2e   : > { %s3368_s22 = scalar_lea.vmem %s3367_s21, 6144  ;;  %p3369_p6 = scmp.lt.s32.totalorder %s3706_s30, %s3367_s21 }
  0x2f   : > { %p3364_p3 = pnand %p3362_p2, %p3716_p7  ;;  %p3370_p8 = scmp.lt.s32.totalorder %s3368_s22, %s3361_s16 }
  0x31   : > { %p3365_p4 = pneg %p3364_p3  ;;  %p3371_p10 = por %p3370_p8, %p3369_p6 }
  0x33   : > { %p3372_p11 = pnand %p3371_p10, %p3365_p4 }
  0x35   : > { %3375 = shalt.err (!%p3372_p11)
}
  0x36   : > { %s3569_s15 = smov 192   ;;  %s3570_s18 = smov 12  }
  0x37   : > { %3155 = dma.hbm_to_vmem [thread:$0]  (!%p3696_p5), %s3704_s23, 3072, %s3706_s30, %s3710_s14, %s3569_s15, %s3569_s15, %s3570_s18  }
  0x38   : > { %s2794_s24 = sshll.u32 %s3693_s17, 7  ;;  %s2903_s20 = sshll.u32 %s3566_s28, 11 }
  0x39   : > { %s4367_s7 = sld [smem:[#allocation23_spill]]  ;;  %s487_s1 = scalar_lea.vmem [#allocation9], %s2794_s24 }
  0x3a   : > { %s494_s29 = sshll.u32 %s487_s1, 4  ;;  %s4368_s13 = sand.u32 1, %s3566_s28   ;;  %s3751_s29 = int_to_ptr.vmem [resolvable:$true] %s494_s29 }
  0x3b   : > { %s3755_s12 = scalar_lea.sflag [#allocation10], %s4368_s13 }
  0x3f   : > { %s3747_s22 = scalar_lea.hbm %s4367_s7, %s2903_s20  ;;  %s3381_s18 = scalar_lea.hbm %s4367_s7, 4096 }
  0x40   : > { %s3376_s23 = scalar_lea.hbm %s3747_s22, 2048  ;;  %p3382_p0 = scmp.lt.u32.totalorder %s3747_s22, %s4367_s7 }
  0x41   : > { %p3377_p9 = scmp.ne.s32.totalorder %s3747_s22, %s3376_s23  ;;  %p3383_p1 = scmp.lt.u32.totalorder %s3381_s18, %s3376_s23 }
  0x42   : > { %p3385_p3 = scmp.lt.u32.totalorder %s3376_s23, %s3747_s22 }
  0x43   : > { %p3379_p12 = pnand %p3377_p9, %p3716_p7  ;;  %p3384_p2 = por %p3383_p1, %p3382_p0 }
  0x45   : > { %p3380_p13 = pneg %p3379_p12  ;;  %p3386_p4 = por %p3385_p3, %p3384_p2 }
  0x47   : > { %p3387_p6 = pnand %p3386_p4, %p3380_p13 }
  0x49   : > { %3390 = shalt.err (!%p3387_p6)
}
  0x4a   : > { %s3391_s1 = scalar_lea.vmem %s3751_s29, 2048  ;;  %s3571_s13 = smov [#allocation9]  }
  0x4b   : > { %p3392_p8 = scmp.ne.s32.totalorder %s3751_s29, %s3391_s1  ;;  %s3396_s30 = sshll.u32 %s3571_s13, 4  ;;  %s3397_s30 = int_to_ptr.vmem [resolvable:$false] %s3396_s30 }
  0x4c   : > { %s3398_s15 = scalar_lea.vmem %s3397_s30, 4096  ;;  %p3399_p9 = scmp.lt.s32.totalorder %s3751_s29, %s3397_s30 }
  0x4d   : > { %p3394_p10 = pnand %p3392_p8, %p3716_p7  ;;  %p3400_p12 = scmp.lt.s32.totalorder %s3398_s15, %s3391_s1 }
  0x4f   : > { %p3395_p11 = pneg %p3394_p10  ;;  %p3401_p0 = por %p3400_p12, %p3399_p9 }
  0x51   : > { %p3402_p1 = pnand %p3401_p0, %p3395_p11 }
  0x53   : > { %3405 = shalt.err (!%p3402_p1)
}
  0x54   : > { %s4342_s23 = smov 128   ;;  %s4343_s18 = smov 8  }
  0x55   : > { %3161 = dma.hbm_to_vmem [thread:$0]  (!%p3696_p5), %s3747_s22, 2048, %s3751_s29, %s3755_s12, %s4342_s23, %s4342_s23, %s4343_s18  }
  0x56   : > { %s4369_s9 = sld [smem:[#allocation25_spill]]  ;;  %s515_s13 = scalar_lea.vmem [#allocation11], %s2794_s24 }
  0x57   : > { %s522_s30 = sshll.u32 %s515_s13, 4  ;;  %s3794_s15 = sadd.s32 4294967295, %s3566_s28   ;;  %s3791_s30 = int_to_ptr.vmem [resolvable:$true] %s522_s30 }
  0x58   : > { %p72_p13 = scmp.ne.s32.totalorder %s3558_s26, %s3554_s25  ;;  %p4344_p2 = scmp.eq.s32.totalorder %s3794_s15, 0 }
  0x59   : > { %p2787_p3 = scmp.ge.s32.totalorder %s3566_s28, 1  ;;  %p390_p4 = scmp.lt.s32.totalorder %s3566_s28, 3 }
  0x5a   : > { %p3803_p6 = por %p4344_p2, %p72_p13  ;;  %s2791_s16 = sshll.u32 %s3693_s17, 6 }
  0x5b   : > { %p3808_p10 = pnand %p2787_p3, %p390_p4  ;;  %s2902_s25 = sshll.u32 %s3566_s28, 10 }
  0x5c   : > { %s3787_s1 = scalar_lea.hbm %s4369_s9, %s2903_s20  ;;  %s3574_s20 = smov [#allocation3]  }
  0x5d   : > { %s4370_s29 = scalar_select %p3803_p6, 1, 0 }
  0x5e   : > { %s4371_s24 = scalar_select %p3808_p10, 1, 0 }
  0x5f   : > { %s402_s22 = sshll.u32 %s3574_s20, 4  ;;  %p3148_p11 = pneg %p3808_p10  ;;  %s403_s22 = int_to_ptr.vmem [resolvable:$true] %s402_s22 }
  0x60   : > { %s4373_s3 = sld [smem:[#allocation22_spill]]  ;;  %s448_s7 = scalar_lea.vmem [#allocation8], %s2791_s16 }
  0x61   : > { %p3818_p9 = pnand %p3148_p11, %p4344_p2  ;;  %s455_s11 = sshll.u32 %s448_s7, 4  ;;  %s3827_s11 = int_to_ptr.vmem [resolvable:$true] %s455_s11 }
  0x62   : > { %s4374_s0 = sld [smem:[#allocation20_spill]] }
  0x63   : > { %p3408_p0 = pneg %p3818_p9 }
  0x66   : > { %s3825_s18 = scalar_lea.hbm %s4373_s3, %s2902_s25 }
  0x68   : > { %s3406_s10 = scalar_lea.hbm %s4374_s0, 256 }
  0x69   : > { %p3407_p12 = scmp.ne.s32.totalorder %s4374_s0, %s3406_s10  ;;  %p3413_p3 = scmp.lt.u32.totalorder %s3406_s10, %s4374_s0 }
  0x6b   : > { %p3409_p1 = pnand %p3408_p0, %p3407_p12 }
  0x6d   : > { %p3410_p13 = pneg %p3409_p1 }
  0x6f   : > { %p3415_p4 = pnand %p3413_p3, %p3410_p13 }
  0x71   : > { %3418 = shalt.err (!%p3415_p4)
}
  0x72   : > { %s3419_s7 = scalar_lea.vmem %s403_s22, 256  ;;  %p3427_p6 = scmp.lt.s32.totalorder %s403_s22, %s403_s22 }
  0x73   : > { %p3420_p11 = scmp.ne.s32.totalorder %s403_s22, %s3419_s7  ;;  %p3428_p10 = scmp.lt.s32.totalorder %s3419_s7, %s3419_s7 }
  0x75   : > { %p3422_p8 = pnand %p3420_p11, %p3408_p0  ;;  %p3429_p5 = por %p3428_p10, %p3427_p6 }
  0x77   : > { %p3423_p2 = pneg %p3422_p8 }
  0x79   : > { %p3430_p7 = pnand %p3429_p5, %p3423_p2 }
  0x7b   : > { %3433 = shalt.err (!%p3430_p7)
}
  0x7c   : > { %s4375_s8 = smov 8   ;;  %s4376_s16 = smov 128  }
  0x7d   : > { %3151 = dma.hbm_to_vmem [thread:$0]  (!%p3818_p9), %s4374_s0, 256, %s403_s22, [#allocation4], %s4376_s16, %s4376_s16, %s4375_s8  }
  0x7e   : > { %s3434_s10 = scalar_lea.hbm %s3825_s18, 1024  ;;  %p4377_p12 = scmp.ne.s32.totalorder %s4366_s27, 0 }
  0x7f   : > { %p3435_p8 = scmp.ne.s32.totalorder %s3825_s18, %s3434_s10  ;;  %s3439_s21 = scalar_lea.hbm %s4373_s3, 2048 }
  0x80   : > { %p3440_p7 = scmp.lt.u32.totalorder %s3825_s18, %s4373_s3  ;;  %p3441_p2 = scmp.lt.u32.totalorder %s3439_s21, %s3434_s10 }
  0x81   : > { %p3437_p6 = pnand %p3435_p8, %p4377_p12  ;;  %p3443_p0 = scmp.lt.u32.totalorder %s3434_s10, %s3825_s18 }
  0x82   : > { %p3442_p10 = por %p3441_p2, %p3440_p7 }
  0x83   : > { %p3438_p5 = pneg %p3437_p6 }
  0x84   : > { %p3444_p1 = por %p3443_p0, %p3442_p10 }
  0x86   : > { %p3445_p13 = pnand %p3444_p1, %p3438_p5 }
  0x88   : > { %3448 = shalt.err (!%p3445_p13)
}
  0x89   : > { %s3449_s22 = scalar_lea.vmem %s3827_s11, 1024  ;;  %s3575_s7 = smov [#allocation8]  }
  0x8a   : > { %p3450_p9 = scmp.ne.s32.totalorder %s3827_s11, %s3449_s22  ;;  %s3454_s8 = sshll.u32 %s3575_s7, 4  ;;  %s3455_s8 = int_to_ptr.vmem [resolvable:$false] %s3454_s8 }
  0x8b   : > { %s3456_s16 = scalar_lea.vmem %s3455_s8, 2048  ;;  %p3457_p11 = scmp.lt.s32.totalorder %s3827_s11, %s3455_s8 }
  0x8c   : > { %p3452_p3 = pnand %p3450_p9, %p4377_p12  ;;  %p3458_p8 = scmp.lt.s32.totalorder %s3456_s16, %s3449_s22 }
  0x8e   : > { %p3453_p4 = pneg %p3452_p3  ;;  %p3459_p6 = por %p3458_p8, %p3457_p11 }
  0x90   : > { %p3460_p7 = pnand %p3459_p6, %p3453_p4 }
  0x92   : > { %3463 = shalt.err (!%p3460_p7)
}
  0x93   : > { %s3576_s25 = smov 64   ;;  %s3577_s17 = smov 4  }
  0x94   : > { %p4378_p5 = scmp.ne.s32.totalorder %s4364_s19, 0  ;;  %s3464_s10 = scalar_lea.hbm %s3787_s1, 2048 }
  0x95   : > { %p3465_p2 = scmp.ne.s32.totalorder %s3787_s1, %s3464_s10  ;;  %s3469_s21 = scalar_lea.hbm %s4369_s9, 4096 }
  0x96   : > { %3158 = dma.hbm_to_vmem [thread:$0]  (!%p4378_p5), %s3825_s18, 1024, %s3827_s11, %s3710_s14, %s3576_s25, %s3576_s25, %s3577_s17  }
  0x97   : > { %p3467_p10 = pnand %p3465_p2, %p4377_p12  ;;  %p3470_p1 = scmp.lt.u32.totalorder %s3787_s1, %s4369_s9 }
  0x98   : > { %p3471_p13 = scmp.lt.u32.totalorder %s3469_s21, %s3464_s10  ;;  %p3473_p3 = scmp.lt.u32.totalorder %s3464_s10, %s3787_s1 }
  0x99   : > { %p3468_p0 = pneg %p3467_p10 }
  0x9a   : > { %p3472_p9 = por %p3471_p13, %p3470_p1 }
  0x9c   : > { %p3474_p4 = por %p3473_p3, %p3472_p9 }
  0x9e   : > { %p3475_p11 = pnand %p3474_p4, %p3468_p0 }
  0xa0   : > { %3478 = shalt.err (!%p3475_p11)
}
  0xa1   : > { %s3479_s11 = scalar_lea.vmem %s3791_s30, 2048  ;;  %s3578_s14 = smov [#allocation11]  }
  0xa2   : > { %p3480_p8 = scmp.ne.s32.totalorder %s3791_s30, %s3479_s11  ;;  %s3484_s18 = sshll.u32 %s3578_s14, 4  ;;  %s3485_s18 = int_to_ptr.vmem [resolvable:$false] %s3484_s18 }
  0xa3   : > { %s3486_s22 = scalar_lea.vmem %s3485_s18, 4096  ;;  %p3487_p2 = scmp.lt.s32.totalorder %s3791_s30, %s3485_s18 }
  0xa4   : > { %p3482_p6 = pnand %p3480_p8, %p4377_p12  ;;  %p3488_p10 = scmp.lt.s32.totalorder %s3486_s22, %s3479_s11 }
  0xa6   : > { %p3483_p7 = pneg %p3482_p6  ;;  %p3489_p1 = por %p3488_p10, %p3487_p2 }
  0xa8   : > { %p3490_p13 = pnand %p3489_p1, %p3483_p7 }
  0xaa   : > { %3493 = shalt.err (!%p3490_p13)
}
  0xab   : > { %3164 = dma.hbm_to_vmem [thread:$0]  (!%p4378_p5), %s3787_s1, 2048, %s3791_s30, %s3755_s12, %s3576_s25, %s3576_s25, %s3577_s17  }
  0xac   : > { %p4379_p12 = scmp.ne.s32.totalorder %s4371_s24, 0 }
  0xad   : > { %p4380_p0 = scmp.eq.s32.totalorder (!%p4379_p12), %s3794_s15, 0 }
  0xae   : > { %552 = sbr.rel (%p4379_p12) target bundleno = 4595 (0x11f3), region = 72 }
  0xb5   : > { %3537 = dma.done.wait (%p4380_p0), [#allocation4], 256   ;;  %p4381_p9 = pmov %p4380_p0 }
  0xb6   : > { %s558_s27 = sand.u32 1, %s3794_s15   ;;  %s560_s19 = sand.u32 1, %s3558_s26  }
  0xb7   : > { %3539 = vsyncadd (%p4381_p9), [#allocation4], 4294967040  ;;  %s3130_s7 = smul.u32 192, %s560_s19  ;;  %s559_s8 = scalar_lea.sflag [#allocation7], %s558_s27 }
  0xb8   : > { %p4382_p3 = scmp.ne.s32.totalorder %s4370_s29, 0 }
  0xb9   : > { %s3906_s16 = scalar_lea.vmem [#allocation6], %s3130_s7 }
  0xba   : > { %3541 = dma.done.wait (%p4382_p3), %s559_s8, 4096  }
  0xbb   : > { %3543 = vsyncadd (%p4382_p3), %s559_s8, 4294963200  ;;  %s2802_s12 = sshll.u32 %s560_s19, 6  ;;  %s2803_s1 = sshll.u32 %s560_s19, 7 }
  0xbc   : > { %s3912_s30 = scalar_lea.vmem [#allocation8], %s2802_s12  ;;  %s577_s24 = scalar_lea.sflag [#allocation10], %s558_s27 }
  0xbd   : > { %s3914_s25 = scalar_lea.vmem [#allocation9], %s2803_s1 }
  0xbe   : > { %3545 = dma.done.wait (%p4382_p3), %s577_s24, 4096  }
  0xbf   : > { %3547 = vsyncadd (%p4382_p3), %s577_s24, 4294963200  ;;  %p668_p5 = scmp.lt.s32.totalorder %s3794_s15, 1  ;;  %s4383_s24 = sld [smem:[#allocation24_spill]] }
  0xc0   : > { %s4384_s21 = sld [smem:[#allocation26_spill]]  ;;  %s4385_s3 = sld [smem:[#allocation27_spill]] }
  0xc1   : > { %s3922_s17 = scalar_select %p668_p5, %s3794_s15, 1 }
  0xc2   : > { %s4386_s9 = sld [smem:[#allocation28_spill]]  ;;  %p4387_p4 = scmp.ne.s32.totalorder %s3794_s15, 0 }
  0xc3   : > { %s3131_s10 = smul.u32 3, %s3922_s17  ;;  %s2805_s7 = sshll.u32 %s3922_s17, 1  ;;  %v699_v0 = vld [vmem:[#allocation3] sm:$0xff] (!%p4387_p4)  ;;  %v700_v1 = vld [vmem:[#allocation3 + $0x8] sm:$0xff] (!%p4387_p4) }
  0xc4   : > { %698 = sbr.rel (%p4387_p4) target bundleno = 203 (0xcb), region = 96  ;;  %701 = vst [vmem:[#allocation2] sm:$0xff] (!%p4387_p4), %v699_v0  ;;  %702 = vst [vmem:[#allocation2 + $0x8] sm:$0xff] (!%p4387_p4), %v700_v1 }
  0xc5   : > { %s3940_s19 = scalar_lea.vmem %s4325_s2, %s3131_s10  ;;  %s3946_s0 = scalar_lea.vmem %s4383_s24, %s2805_s7 }
  0xc6   : > { %s687_s29 = scalar_lea.vmem %s4384_s21, %s3922_s17  ;;  %s690_s11 = scalar_lea.vmem %s4385_s3, %s3922_s17 }
  0xc7   : > { %s3960_s10 = scalar_lea.vmem [#allocation11], %s2803_s1 }
  0xc8   : > { %s693_s22 = scalar_lea.vmem %s4386_s9, %s3922_s17 }
  0xcb PF: > { %v3218_v2 = vld [vmem:[%s3906_s16 + $0x4] ss:$12 sps:$4 sm:$0xff]   ;;  %v3220_v3 = vld [vmem:[%s3906_s16] ss:$12 sps:$4 sm:$0xff]   ;;  %v3579_v4 = vmov 0   ;;  %v3580_v5 = vmov 0.0   ;;  %v740_v31 = vlaneseq  ;;  %s4389_s27 = scalar_lea.vmem %s4328_s5, %s3922_s17  ;;  %s4390_s7 = scalar_lea.vmem %s4329_s6, %s3922_s17 }
  0xcc   : > { %915 = vmatprep.mubr.bf16.mxu0 %v3579_v4  ;;  %2980 = vmatprep.subr.bf16.mxu1 %v3580_v5  ;;  %v3221_v6 = vld [vmem:[%s3906_s16 + $0x1c] ss:$12 sps:$4 sm:$0xff]   ;;  %v3223_v7 = vld [vmem:[%s3906_s16 + $0x18] ss:$12 sps:$4 sm:$0xff]   ;;  %v3224_v8 = vld [vmem:[%s3906_s16 + $0x34] ss:$12 sps:$4 sm:$0xff]  }
  0xcd   : > { %883 = vmatprep.subr.bf16.mxu0 %v3218_v2  ;;  %v3226_v9 = vld [vmem:[%s3906_s16 + $0x30] ss:$12 sps:$4 sm:$0xff]   ;;  %v3227_v10 = vld [vmem:[%s3906_s16 + $0x4c] ss:$12 sps:$4 sm:$0xff]   ;;  %v3229_v11 = vld [vmem:[%s3906_s16 + $0x48] ss:$12 sps:$4 sm:$0xff]  }
  0xce   : > { %884 = vmatpush1.bf16.msra.mxu0 %v3220_v3  ;;  %v3230_v12 = vld [vmem:[%s3906_s16 + $0x64] ss:$12 sps:$4 sm:$0xff]   ;;  %v3242_v13 = vld [vmem:[%s3906_s16 + $0x8] ss:$12 sps:$4 sm:$0xff]   ;;  %v3243_v14 = vld [vmem:[%s3906_s16 + $0x20] ss:$12 sps:$4 sm:$0xff]  }
  0xcf   : > { %885 = vmatprep.subr.bf16.mxu0 %v3221_v6  ;;  %2981 = vmatpush3.bf16.msra.mxu1 %v3242_v13  ;;  %v3232_v15 = vld [vmem:[%s3906_s16 + $0x60] ss:$12 sps:$4 sm:$0xff]   ;;  %v3233_v16 = vld [vmem:[%s3906_s16 + $0x7c] ss:$12 sps:$4 sm:$0xff]   ;;  %v3235_v17 = vld [vmem:[%s3906_s16 + $0x78] ss:$12 sps:$4 sm:$0xff]  }
  0xd0   : > { %2982 = vmatprep.subr.bf16.mxu1 %v3580_v5  ;;  %v3236_v18 = vld [vmem:[%s3906_s16 + $0x94] ss:$12 sps:$4 sm:$0xff]   ;;  %v3244_v19 = vld [vmem:[%s3906_s16 + $0x38] ss:$12 sps:$4 sm:$0xff]   ;;  %v3245_v20 = vld [vmem:[%s3906_s16 + $0x50] ss:$12 sps:$4 sm:$0xff]  }
  0xd1   : > { %v3238_v21 = vld [vmem:[%s3906_s16 + $0x90] ss:$12 sps:$4 sm:$0xff]   ;;  %v3239_v22 = vld [vmem:[%s3906_s16 + $0xac] ss:$12 sps:$4 sm:$0xff]   ;;  %v3246_v23 = vld [vmem:[%s3906_s16 + $0x68] ss:$12 sps:$4 sm:$0xff]  }
  0xd2   : > { %886 = vmatpush1.bf16.msra.mxu0 %v3223_v7  ;;  %v3241_v24 = vld [vmem:[%s3906_s16 + $0xa8] ss:$12 sps:$4 sm:$0xff]   ;;  %v3990_v25 = vld [vmem:[#allocation2] sm:$0xff]  ;;  %v3249_v30 = vld [vmem:[%s3906_s16 + $0xb0] ss:$12 sps:$4 sm:$0xff]   ;;  %vm3581_vm0 = vmmov 0  }
  0xd3   : > { %887 = vmatprep.subr.bf16.mxu0 %v3224_v8  ;;  %2983 = vmatpush3.bf16.msra.mxu1 %v3243_v14  ;;  %v3992_v26 = vld [vmem:[#allocation2 + $0x8] sm:$0xff]  ;;  %v3248_v29 = vld [vmem:[%s3906_s16 + $0x98] ss:$12 sps:$4 sm:$0xff]   ;;  %v4011_v32 = vshrl.u32 %v740_v31, 7  ;;  %v738_v34 = vld [vmem:[%s3940_s19] sm:$0x7] }
  0xd4   : > { %2984 = vmatprep.subr.bf16.mxu1 %v3580_v5  ;;  %v3247_v27 = vld [vmem:[%s3906_s16 + $0x80] ss:$12 sps:$4 sm:$0xff]   ;;  %v705_v28 = vpack.c.bf16 %v3992_v26, %v3990_v25  ;;  %2996 = vmatprep.mubr.msk.bf16.mxu1 %vm3581_vm0, %v3580_v5  ;;  %vm989_vm1 = vcmask 261120   ;;  %s3582_s3 = smov 96   ;;  %vm1112_vm2 = vcmask 1043456   ;;  %vm1084_vm3 = vcmask 64512  }
  0xd5   : > { %v746_v33 = vsub.s32 1, %v4011_v32  ;;  %v742_v36 = vsub.s32 0, %v4011_v32  ;;  %v750_v52 = vsub.s32 2, %v4011_v32  ;;  %s3583_s9 = smov 64   ;;  %s3584_s16 = smov 32  }
  0xd6   : > { %888 = vmatpush1.bf16.msra.mxu0 %v3226_v9  ;;  %p2897_p11 = scmp.ne.s32.totalorder %s3794_s15, 1 }
  0xd7   : > { %889 = vmatprep.subr.bf16.mxu0 %v3227_v10  ;;  %2985 = vmatpush3.bf16.msra.mxu1 %v3244_v19  ;;  %v747_v35 = vrot.slane %v738_v34, %v746_v33  ;;  %v743_v42 = vrot.slane %v738_v34, %v742_v36  ;;  %v751_v53 = vrot.slane %v738_v34, %v750_v52 }
  0xd8   : > { %2986 = vmatprep.subr.bf16.mxu1 %v3580_v5 }
  0xda   : > { %890 = vmatpush1.bf16.msra.mxu0 %v3229_v11 }
  0xdb   : > { %891 = vmatprep.subr.bf16.mxu0 %v3230_v12  ;;  %2987 = vmatpush3.bf16.msra.mxu1 %v3245_v20 }
  0xdc   : > { %2988 = vmatprep.subr.bf16.mxu1 %v3580_v5 }
  0xde   : > { %892 = vmatpush1.bf16.msra.mxu0 %v3232_v15 }
  0xdf   : > { %893 = vmatprep.subr.bf16.mxu0 %v3233_v16  ;;  %2989 = vmatpush3.bf16.msra.mxu1 %v3246_v23 }
  0xe0   : > { %2990 = vmatprep.subr.bf16.mxu1 %v3580_v5 }
  0xe2   : > { %894 = vmatpush1.bf16.msra.mxu0 %v3235_v17 }
  0xe3   : > { %895 = vmatprep.subr.bf16.mxu0 %v3236_v18  ;;  %2991 = vmatpush3.bf16.msra.mxu1 %v3247_v27 }
  0xe4   : > { %2992 = vmatprep.subr.bf16.mxu1 %v3580_v5 }
  0xe6   : > { %896 = vmatpush1.bf16.msra.mxu0 %v3238_v21 }
  0xe7   : > { %897 = vmatprep.subr.bf16.mxu0 %v3239_v22  ;;  %2993 = vmatpush3.bf16.msra.mxu1 %v3248_v29 }
  0xe8   : > { %2994 = vmatprep.subr.bf16.mxu1 %v3580_v5 }
  0xea   : > { %898 = vmatpush1.bf16.msra.mxu0 %v3241_v24 }
  0xeb   : > { %3000 = vmatprep.subr.bf16.mxu0 %v3580_v5  ;;  %2995 = vmatpush3.bf16.msra.mxu1 %v3249_v30 }
  0xec   : > { %3006 = vmatprep.subr.bf16.mxu1 %v3580_v5 }
  0xed   : > { %916 = vmatmul.mubr.bf16.vlgmr.msra.gmra.mrb[0].mxu0 %v705_v28 }
  0xee   : > { %3002 = vmatprep.mubr.msk.bf16.mxu0 %vm3581_vm0, %v3580_v5  ;;  %2997 = vmatmul.mubr.bf16.vlgmr.msra.gmra.mrb[0].mxu1 %v705_v28 }
  0xef   : > { %3008 = vmatprep.mubr.msk.bf16.mxu1 %vm3581_vm0, %v3580_v5 }
 0x1c0   : > { %v917_v37 = vpop.f32.mrb[0].mxu0 }
 0x1c1   : > { %v919_v38 = vpop.f32.mrb[1].mxu0  ;;  %v918_v47 = vadd.f32 %v917_v37, %v743_v42  ;;  %v960_v54 = vpop.f32.mrb[0].mxu1 }
 0x1c2   : > { %v920_v39 = vadd.f32 %v919_v38, %v747_v35  ;;  %v921_v40 = vpop.f32.mrb[2].mxu0  ;;  %v961_v55 = vadd.f32 %v960_v54, %v751_v53  ;;  %v2998_v56 = vpop.f32.mrb[1].mxu1 }
 0x1c3   : > { %v923_v41 = vpop.f32.mrb[3].mxu0  ;;  %v922_v49 = vadd.f32 %v921_v40, %v743_v42  ;;  %v4032_v50 = vpack.c.bf16 %v918_v47, %v918_v47  ;;  %v963_v57 = vpop.f32.mrb[2].mxu1 }
 0x1c4   : > { %v4020_v43 = vpack.c.bf16 %v920_v39, %v920_v39  ;;  %v924_v44 = vadd.f32 %v923_v41, %v747_v35  ;;  %v964_v58 = vadd.f32 %v963_v57, %v751_v53  ;;  %v2999_v59 = vpop.f32.mrb[3].mxu1  ;;  %v4045_v60 = vpack.c.bf16 %v961_v55, %v961_v55 }
 0x1c5   : > { %v4034_v51 = vpack.c.bf16 %v922_v49, %v922_v49 }
 0x1c6   : > { %v4022_v45 = vpack.c.bf16 %v924_v44, %v924_v44  ;;  %v994_v46 = vsel %vm989_vm1, %v4020_v43, 0  ;;  %v4047_v61 = vpack.c.bf16 %v964_v58, %v964_v58  ;;  %v1114_v62 = vsel %vm1112_vm2, %v4045_v60, 0 }
 0x1c7   : > { %3001 = vmatpush3.bf16.xpose.msra.mxu0 %v994_v46 }
 0x1c8   : > { %1259 = vrot.lane.b32.xlu1 %v4022_v45, %s3582_s3  ;;  %v1040_v48 = vsel %vm989_vm1, %v4022_v45, 0  ;;  %3012 = vmatprep.subr.bf16.mxu0 %v3580_v5  ;;  %v1160_v63 = vsel %vm1112_vm2, %v4047_v61, 0 }
 0x1c9   : > { %3007 = vmatpush3.bf16.xpose.msra.mxu1 %v1040_v48 }
 0x1ca   : > { %3018 = vmatprep.subr.bf16.mxu1 %v3580_v5 }
 0x1ce   : > { %3003 = vmatmul.mubr.msk.bf16.vlgmr.msra.gmra.mrb[4].mxu0 %vm989_vm1, %v4032_v50 }
 0x1cf   : > { %3014 = vmatprep.mubr.msk.bf16.mxu0 %vm3581_vm0, %v3580_v5  ;;  %3013 = vmatpush3.bf16.msra.mxu0 %v1114_v62 }
 0x1d0   : > { %3009 = vmatmul.mubr.msk.bf16.vlgmr.msra.gmra.mrb[4].mxu1 %vm989_vm1, %v4034_v51  ;;  %3024 = vmatprep.subr.bf16.mxu0 %v3580_v5 }
 0x1d1   : > { %3020 = vmatprep.mubr.msk.bf16.mxu1 %vm3581_vm0, %v3580_v5  ;;  %3019 = vmatpush3.bf16.msra.mxu1 %v1160_v63 }
 0x1d2   : > { %3030 = vmatprep.subr.bf16.mxu1 %v3580_v5 }
 0x23a   : > { %v1260_v24 = vpop.permute.xlu1 %1259 }
 0x23b   : > { %v1265_v40 = vsel %vm989_vm1, %v1260_v24, 0 }
 0x2a1   : > { %v1030_v0 = vpop.f32.mrb[4].mxu0 }
 0x2a2   : > { %v1082_v1 = vmul.f32 0.17677669, %v1030_v0  ;;  %v3004_v2 = vpop.f32.mrb[5].mxu0 }
 0x2a3   : > { %v1033_v3 = vpop.f32.mrb[6].mxu0  ;;  %v1076_v6 = vpop.f32.mrb[4].mxu1 }
 0x2a4   : > { %v1083_v7 = vmul.f32 0.17677669, %v1076_v6  ;;  %v3005_v8 = vpop.f32.mrb[7].mxu0  ;;  %v3010_v9 = vpop.f32.mrb[5].mxu1  ;;  %v1085_v10 = vsel %vm1084_vm3, %v1082_v1, -inf }
 0x2a5   : > { %v1079_v11 = vpop.f32.mrb[6].mxu1  ;;  %1086 = vmax.xlane.f32.xlu0 %v1085_v10 }
 0x2a6   : > { %v3011_v12 = vpop.f32.mrb[7].mxu1  ;;  %v1088_v13 = vsel %vm1084_vm3, %v1083_v7, -inf }
 0x2a9   : > { %1089 = vmax.xlane.f32.xlu0 %v1088_v13 }
 0x2bf   : > { %1207 = vrot.lane.b32.xlu0 %v4020_v43, %s3582_s3 }
 0x332   : > { %v1087_v14 = vpop.xlane.xlu0 %1086 }
 0x333   : > { %v1091_v15 = vsub.f32 %v1082_v1, %v1087_v14 }
 0x335   : > { %v1093_v16 = vmul.f32 1.442695, %v1091_v15 }
 0x336   : > { %v1090_v17 = vpop.xlane.xlu0 %1089 }
 0x337   : > { %3298 = vpow2.f32 %v1093_v16  ;;  %v1092_v18 = vsub.f32 %v1083_v7, %v1090_v17 }
 0x339   : > { %v1095_v19 = vmul.f32 1.442695, %v1092_v18 }
 0x33a   : > { %v1208_v31 = vpop.permute.xlu0 %1207 }
 0x33b   : > { %3300 = vpow2.f32 %v1095_v19  ;;  %v1213_v37 = vsel %vm989_vm1, %v1208_v31, 0 }
 0x341   : > { %v3299_v20 = vpop.eup %3298 }
 0x342   : > { %v1097_v21 = vsel %vm1084_vm3, %v3299_v20, 0.0 }
 0x343   : > { %1098 = vadd.xlane.f32.xlu1 %v1097_v21 }
 0x345   : > { %v3301_v22 = vpop.eup %3300 }
 0x346   : > { %v1100_v23 = vsel %vm1084_vm3, %v3301_v22, 0.0 }
 0x347   : > { %1101 = vadd.xlane.f32.xlu1 %v1100_v23 }
 0x358   : > { %1204 = vrot.lane.b32.xlu1 %v4032_v50, %s3582_s3 }
 0x35c   : > { %1256 = vrot.lane.b32.xlu1 %v4034_v51, %s3582_s3 }
 0x3d0   : > { %v1099_v27 = vpop.xlane.xlu1 %1098 }
 0x3d1   : > { %3302 = vrcp.f32 %v1099_v27 }
 0x3d4   : > { %v1102_v28 = vpop.xlane.xlu1 %1101 }
 0x3d5   : > { %3304 = vrcp.f32 %v1102_v28  ;;  %v3252_v28 = vld [vmem:[%s3912_s30 + $0x10] sm:$0xff]  }
 0x3d8   : > { %v1205_v41 = vpop.permute.xlu1 %1204 }
 0x3db   : > { %v3303_v29 = vpop.eup %3302 }
 0x3dc   : > { %v1105_v30 = vmul.f32 %v3303_v29, %v3299_v20  ;;  %v1257_v42 = vpop.permute.xlu1 %1256 }
 0x3de   : > { %v1107_v34 = vpack.c.bf16 %v1105_v30, %v1105_v30 }
 0x3df   : > { %v3305_v35 = vpop.eup %3304 }
 0x3e0   : > { %v1106_v38 = vmul.f32 %v3305_v35, %v3301_v22  ;;  %3015 = vmatmul.mubr.msk.bf16.vlgmr.msra.gmra.mrb[8].mxu0 %vm1084_vm3, %v1107_v34  ;;  %v3250_v34 = vld [vmem:[%s3912_s30] sm:$0xff]  }
 0x3e1   : > { %3025 = vmatpush3.bf16.xpose.msra.mxu0 %v1213_v37  ;;  %3026 = vmatprep.mubr.msk.bf16.mxu0 %vm3581_vm0, %v3580_v5  ;;  %v3253_v37 = vld [vmem:[%s3912_s30 + $0x18] sm:$0xff]  }
 0x3e2   : > { %v1108_v39 = vpack.c.bf16 %v1106_v38, %v1106_v38  ;;  %3036 = vmatprep.subr.bf16.mxu0 %v3580_v5  ;;  %v3251_v38 = vld [vmem:[%s3912_s30 + $0x8] sm:$0xff]  }
 0x3e4   : > { %3021 = vmatmul.mubr.msk.bf16.vlgmr.msra.gmra.mrb[8].mxu1 %vm1084_vm3, %v1108_v39 }
 0x3e5   : > { %3031 = vmatpush3.bf16.xpose.msra.mxu1 %v1265_v40  ;;  %3032 = vmatprep.mubr.msk.bf16.mxu1 %vm3581_vm0, %v3580_v5 }
 0x3e6   : > { %3042 = vmatprep.subr.bf16.mxu1 %v3580_v5 }
 0x3e8   : > { %3027 = vmatmul.mubr.msk.bf16.vlgmr.msra.gmra.mrb[12].mxu0 %vm989_vm1, %v1205_v41 }
 0x3e9   : > { %3038 = vmatprep.mubr.msk.bf16.mxu0 %vm3581_vm0, %v3580_v5 }
 0x3ec   : > { %3033 = vmatmul.mubr.msk.bf16.vlgmr.msra.gmra.mrb[12].mxu1 %vm989_vm1, %v1257_v42 }
 0x3ed   : > { %3044 = vmatprep.mubr.msk.bf16.mxu1 %vm3581_vm0, %v3580_v5 }
 0x4b3   : > { %v4081_v44 = vpop.f32.mrb[8].mxu0 }
 0x4b4   : > { %v3016_v46 = vpop.f32.mrb[9].mxu0 }
 0x4b5   : > { %v1153_v47 = vpop.f32.mrb[10].mxu0 }
 0x4b6   : > { %v3017_v48 = vpop.f32.mrb[11].mxu0 }
 0x4b7   : > { %v4083_v49 = vpop.f32.mrb[8].mxu1 }
 0x4b8   : > { %v1202_v52 = vpack.c.bf16 %v4083_v49, %v4081_v44  ;;  %v3022_v53 = vpop.f32.mrb[9].mxu1 }
 0x4b9   : > { %v1199_v54 = vpop.f32.mrb[10].mxu1 }
 0x4ba   : > { %v3023_v55 = vpop.f32.mrb[11].mxu1 }
 0x4bb   : > { %v1249_v56 = vpop.f32.mrb[12].mxu0 }
 0x4bc   : > { %v1307_v57 = vmul.f32 0.17677669, %v1249_v56  ;;  %v3028_v58 = vpop.f32.mrb[13].mxu0 }
 0x4bd   : > { %v1252_v59 = vpop.f32.mrb[14].mxu0 }
 0x4be   : > { %v3029_v62 = vpop.f32.mrb[15].mxu0  ;;  %v1309_v63 = vsel %vm1084_vm3, %v1307_v57, -inf }
 0x4bf   : > { %v1301_v0 = vpop.f32.mrb[12].mxu1  ;;  %1310 = vmax.xlane.f32.xlu0 %v1309_v63 }
 0x4c0   : > { %v1308_v1 = vmul.f32 0.17677669, %v1301_v0  ;;  %v3034_v2 = vpop.f32.mrb[13].mxu1 }
 0x4c1   : > { %v1304_v3 = vpop.f32.mrb[14].mxu1 }
 0x4c2   : > { %v3035_v6 = vpop.f32.mrb[15].mxu1  ;;  %v1312_v7 = vsel %vm1084_vm3, %v1308_v1, -inf }
 0x4c3   : > { %1313 = vmax.xlane.f32.xlu1 %v1312_v7 }
 0x4d4   : > { %1383 = vrot.lane.b32.xlu1 %v4047_v61, %s3582_s3 }
 0x4d8   : > { %1546 = vrot.lane.b32.xlu1 %v4020_v43, %s3583_s9 }
 0x4dc   : > { %1596 = vrot.lane.b32.xlu1 %v4022_v45, %s3583_s9 }
 0x4e0   : > { %1594 = vrot.lane.b32.xlu1 %v4034_v51, %s3583_s9 }
 0x54c   : > { %v1311_v8 = vpop.xlane.xlu0 %1310 }
 0x54d   : > { %v1315_v9 = vsub.f32 %v1307_v57, %v1311_v8 }
 0x54f   : > { %v1317_v10 = vmul.f32 1.442695, %v1315_v9 }
 0x550   : > { %v1314_v11 = vpop.xlane.xlu1 %1313 }
 0x551   : > { %3306 = vpow2.f32 %v1317_v10  ;;  %v1316_v12 = vsub.f32 %v1308_v1, %v1314_v11 }
 0x553   : > { %v1319_v13 = vmul.f32 1.442695, %v1316_v12 }
 0x554   : > { %v1384_v14 = vpop.permute.xlu1 %1383 }
 0x555   : > { %3308 = vpow2.f32 %v1319_v13  ;;  %v1389_v15 = vsel %vm1112_vm2, %v1384_v14, 0 }
 0x556   : > { %3043 = vmatpush3.bf16.msra.mxu1 %v1389_v15 }
 0x557   : > { %3056 = vmatprep.subr.bf16.mxu1 %v3580_v5 }
 0x558   : > { %v1547_v39 = vpop.permute.xlu1 %1546 }
 0x559   : > { %v1552_v55 = vsel %vm989_vm1, %v1547_v39, 0 }
 0x55b   : > { %v3307_v16 = vpop.eup %3306 }
 0x55c   : > { %v1321_v17 = vsel %vm1084_vm3, %v3307_v16, 0.0  ;;  %v1597_v40 = vpop.permute.xlu1 %1596 }
 0x55d   : > { %1322 = vadd.xlane.f32.xlu0 %v1321_v17  ;;  %v1602_v41 = vsel %vm989_vm1, %v1597_v40, 0 }
 0x55f   : > { %v3309_v18 = vpop.eup %3308 }
 0x560   : > { %v1324_v19 = vsel %vm1084_vm3, %v3309_v18, 0.0  ;;  %v1595_v42 = vpop.permute.xlu1 %1594 }
 0x561   : > { %1325 = vadd.xlane.f32.xlu0 %v1324_v19 }
 0x577   : > { %1334 = vrot.lane.b32.xlu0 %v4045_v60, %s3582_s3 }
 0x57b   : > { %1544 = vrot.lane.b32.xlu0 %v4032_v50, %s3583_s9 }
 0x5ea   : > { %v1323_v20 = vpop.xlane.xlu0 %1322 }
 0x5eb   : > { %3310 = vrcp.f32 %v1323_v20 }
 0x5ee   : > { %v1326_v21 = vpop.xlane.xlu0 %1325 }
 0x5ef   : > { %3312 = vrcp.f32 %v1326_v21 }
 0x5f2   : > { %v1335_v22 = vpop.permute.xlu0 %1334 }
 0x5f3   : > { %v1340_v23 = vsel %vm1112_vm2, %v1335_v22, 0 }
 0x5f4   : > { %3037 = vmatpush3.bf16.msra.mxu0 %v1340_v23 }
 0x5f5   : > { %v3311_v24 = vpop.eup %3310  ;;  %3048 = vmatprep.subr.bf16.mxu0 %v3580_v5 }
 0x5f6   : > { %v1329_v27 = vmul.f32 %v3311_v24, %v3307_v16  ;;  %v1545_v59 = vpop.permute.xlu0 %1544 }
 0x5f8   : > { %v1331_v29 = vpack.c.bf16 %v1329_v27, %v1329_v27 }
 0x5f9   : > { %v3313_v30 = vpop.eup %3312 }
 0x5fa   : > { %v1330_v31 = vmul.f32 %v3313_v30, %v3309_v18  ;;  %3039 = vmatmul.mubr.msk.bf16.vlgmr.msra.gmra.mrb[16].mxu0 %vm1084_vm3, %v1331_v29 }
 0x5fb   : > { %3049 = vmatpush3.bf16.msra.mxu0 %v3252_v28  ;;  %3052 = vmatprep.mubr.msk.bf16.mxu0 %vm3581_vm0, %v3580_v5 }
 0x5fc   : > { %v1332_v35 = vpack.c.bf16 %v1330_v31, %v1330_v31  ;;  %3050 = vmatprep.subr.bf16.mxu0 %v3580_v5 }
 0x5fe   : > { %3045 = vmatmul.mubr.msk.bf16.vlgmr.msra.gmra.mrb[16].mxu1 %vm1084_vm3, %v1332_v35 }
 0x5ff   : > { %3057 = vmatpush3.bf16.msra.mxu1 %v3250_v34  ;;  %3060 = vmatprep.mubr.msk.bf16.mxu1 %vm3581_vm0, %v3580_v5 }
 0x600   : > { %3058 = vmatprep.subr.bf16.mxu1 %v3580_v5  ;;  %3051 = vmatpush3.bf16.msra.mxu0 %v3253_v37 }
 0x601   : > { %3064 = vmatprep.subr.bf16.mxu0 %v3580_v5 }
 0x603   : > { %3059 = vmatpush3.bf16.msra.mxu1 %v3251_v38 }
 0x604   : > { %3070 = vmatprep.subr.bf16.mxu1 %v3580_v5 }
 0x606   : > { %3061 = vmatmul.mubr.msk.bf16.vlgmr.msra.gmra.mrb[20].mxu1 %vm989_vm1, %v1202_v52 }
 0x607   : > { %3072 = vmatprep.mubr.msk.bf16.mxu1 %vm3581_vm0, %v3580_v5 }
 0x60c   : > { %3071 = vmatpush3.bf16.xpose.msra.mxu1 %v1602_v41 }
 0x60d   : > { %3082 = vmatprep.subr.bf16.mxu1 %v3580_v5 }
 0x613   : > { %3073 = vmatmul.mubr.msk.bf16.vlgmr.msra.gmra.mrb[24].mxu1 %vm989_vm1, %v1595_v42 }
 0x614   : > { %3084 = vmatprep.mubr.msk.bf16.mxu1 %vm3581_vm0, %v3580_v5 }
 0x6cd   : > { %v1376_v46 = vpop.f32.mrb[16].mxu0 }
 0x6ce   : > { %v3040_v47 = vpop.f32.mrb[17].mxu0 }
 0x6cf   : > { %v1379_v44 = vpop.f32.mrb[18].mxu0 }
 0x6d0   : > { %v3041_v48 = vpop.f32.mrb[19].mxu0 }
 0x6d1   : > { %v1425_v49 = vpop.f32.mrb[16].mxu1  ;;  %v3254_v48 = vld [vmem:[%s3912_s30 + $0x20] sm:$0xff]  }
 0x6d2   : > { %v1431_v52 = vpack.c.bf16 %v1425_v49, %v1376_v46  ;;  %v3046_v53 = vpop.f32.mrb[17].mxu1 }
 0x6d3   : > { %v1428_v54 = vpop.f32.mrb[18].mxu1 }
 0x6d4   : > { %v3047_v56 = vpop.f32.mrb[19].mxu1  ;;  %3053 = vmatmul.mubr.msk.bf16.vlgmr.msra.gmra.mrb[20].mxu0 %vm989_vm1, %v1431_v52 }
 0x6d5   : > { %3065 = vmatpush3.bf16.xpose.msra.mxu0 %v1552_v55  ;;  %3066 = vmatprep.mubr.msk.bf16.mxu0 %vm3581_vm0, %v3580_v5  ;;  %v3255_v55 = vld [vmem:[%s3912_s30 + $0x28] sm:$0xff]  }
 0x6d6   : > { %3076 = vmatprep.subr.bf16.mxu0 %v3580_v5 }
 0x6d9   : > { %v1537_v57 = vpop.f32.mrb[20].mxu1 }
 0x6da   : > { %v3062_v58 = vpop.f32.mrb[21].mxu1 }
 0x6db   : > { %v1540_v62 = vpop.f32.mrb[22].mxu1 }
 0x6dc   : > { %v3063_v63 = vpop.f32.mrb[23].mxu1  ;;  %3067 = vmatmul.mubr.msk.bf16.vlgmr.msra.gmra.mrb[24].mxu0 %vm989_vm1, %v1545_v59 }
 0x6dd   : > { %3078 = vmatprep.mubr.msk.bf16.mxu0 %vm3581_vm0, %v3580_v5 }
 0x6e6   : > { %v1638_v0 = vpop.f32.mrb[24].mxu1 }
 0x6e7   : > { %v1645_v1 = vmul.f32 0.17677669, %v1638_v0  ;;  %v3074_v2 = vpop.f32.mrb[25].mxu1 }
 0x6e8   : > { %v1641_v3 = vpop.f32.mrb[26].mxu1 }
 0x6e9   : > { %v3075_v6 = vpop.f32.mrb[27].mxu1  ;;  %v1649_v7 = vsel %vm1084_vm3, %v1645_v1, -inf }
 0x6ea   : > { %1650 = vmax.xlane.f32.xlu1 %v1649_v7 }
 0x6fb   : > { %1718 = vrot.lane.b32.xlu1 %v4047_v61, %s3583_s9 }
 0x6ff   : > { %1827 = vrot.lane.b32.xlu1 %v4020_v43, %s3584_s16 }
 0x703   : > { %1877 = vrot.lane.b32.xlu1 %v4022_v45, %s3584_s16 }
 0x707   : > { %1875 = vrot.lane.b32.xlu1 %v4034_v51, %s3584_s16 }
 0x777   : > { %v1651_v8 = vpop.xlane.xlu1 %1650 }
 0x778   : > { %v1653_v11 = vsub.f32 %v1645_v1, %v1651_v8 }
 0x77a   : > { %v1656_v12 = vmul.f32 1.442695, %v1653_v11 }
 0x77b   : > { %v1719_v9 = vpop.permute.xlu1 %1718 }
 0x77c   : > { %v1724_v10 = vsel %vm1112_vm2, %v1719_v9, 0  ;;  %3314 = vpow2.f32 %v1656_v12 }
 0x77d   : > { %3083 = vmatpush3.bf16.msra.mxu1 %v1724_v10 }
 0x77e   : > { %3096 = vmatprep.subr.bf16.mxu1 %v3580_v5 }
 0x77f   : > { %v1828_v37 = vpop.permute.xlu1 %1827 }
 0x780   : > { %v1833_v39 = vsel %vm989_vm1, %v1828_v37, 0 }
 0x783   : > { %v1878_v0 = vpop.permute.xlu1 %1877 }
 0x784   : > { %v1883_v7 = vsel %vm989_vm1, %v1878_v0, 0 }
 0x786   : > { %v3315_v22 = vpop.eup %3314 }
 0x787   : > { %v1661_v23 = vsel %vm1084_vm3, %v3315_v22, 0.0  ;;  %v1876_v9 = vpop.permute.xlu1 %1875 }
 0x7a7   : > { %v1481_v13 = vpop.f32.mrb[20].mxu0 }
 0x7a8   : > { %v4151_v14 = vadd.f32 %v1537_v57, %v1481_v13  ;;  %v3054_v15 = vpop.f32.mrb[21].mxu0 }
 0x7a9   : > { %v1484_v43 = vpop.f32.mrb[22].mxu0 }
 0x7aa   : > { %v4153_v16 = vadd.f32 %v1540_v62, %v1484_v43  ;;  %v3055_v45 = vpop.f32.mrb[23].mxu0 }
 0x7af   : > { %v1588_v17 = vpop.f32.mrb[24].mxu0 }
 0x7b0   : > { %v1644_v51 = vmul.f32 0.17677669, %v1588_v17  ;;  %v3068_v18 = vpop.f32.mrb[25].mxu0 }
 0x7b1   : > { %v1591_v19 = vpop.f32.mrb[26].mxu0 }
 0x7b2   : > { %v3069_v20 = vpop.f32.mrb[27].mxu0  ;;  %v1646_v21 = vsel %vm1084_vm3, %v1644_v51, -inf }
 0x7b3   : > { %1647 = vmax.xlane.f32.xlu0 %v1646_v21 }
 0x7b7   : > { %1662 = vadd.xlane.f32.xlu0 %v1661_v23 }
 0x840   : > { %v1648_v24 = vpop.xlane.xlu0 %1647 }
 0x841   : > { %v1652_v27 = vsub.f32 %v1644_v51, %v1648_v24 }
 0x843   : > { %v1654_v28 = vmul.f32 1.442695, %v1652_v27 }
 0x844   : > { %v1663_v29 = vpop.xlane.xlu0 %1662 }
 0x845   : > { %3316 = vpow2.f32 %v1654_v28 }
 0x846   : > { %3318 = vrcp.f32 %v1663_v29 }
 0x84f   : > { %v3317_v30 = vpop.eup %3316 }
 0x850   : > { %v3319_v31 = vpop.eup %3318  ;;  %v1658_v34 = vsel %vm1084_vm3, %v3317_v30, 0.0 }
 0x851   : > { %v1667_v35 = vmul.f32 %v3319_v31, %v3315_v22  ;;  %1659 = vadd.xlane.f32.xlu0 %v1658_v34 }
 0x853   : > { %v1669_v38 = vpack.c.bf16 %v1667_v35, %v1667_v35 }
 0x855   : > { %3085 = vmatmul.mubr.msk.bf16.vlgmr.msra.gmra.mrb[28].mxu1 %vm1084_vm3, %v1669_v38 }
 0x856   : > { %3097 = vmatpush3.bf16.xpose.msra.mxu1 %v1833_v39  ;;  %3098 = vmatprep.mubr.msk.bf16.mxu1 %vm3581_vm0, %v3580_v5 }
 0x857   : > { %3108 = vmatprep.subr.bf16.mxu1 %v3580_v5 }
 0x867   : > { %1670 = vrot.lane.b32.xlu0 %v4045_v60, %s3583_s9 }
 0x86b   : > { %1825 = vrot.lane.b32.xlu0 %v4032_v50, %s3584_s16 }
 0x8de   : > { %v1660_v40 = vpop.xlane.xlu0 %1659 }
 0x8df   : > { %3320 = vrcp.f32 %v1660_v40 }
 0x8e2   : > { %v1671_v41 = vpop.permute.xlu0 %1670 }
 0x8e3   : > { %v1676_v42 = vsel %vm1112_vm2, %v1671_v41, 0 }
 0x8e4   : > { %3077 = vmatpush3.bf16.msra.mxu0 %v1676_v42 }
 0x8e5   : > { %3088 = vmatprep.subr.bf16.mxu0 %v3580_v5 }
 0x8e6   : > { %v1826_v46 = vpop.permute.xlu0 %1825 }
 0x8e7   : > { %3099 = vmatmul.mubr.msk.bf16.vlgmr.msra.gmra.mrb[32].mxu1 %vm989_vm1, %v1826_v46 }
 0x8e8   : > { %3110 = vmatprep.mubr.msk.bf16.mxu1 %vm3581_vm0, %v3580_v5 }
 0x8e9   : > { %v3321_v47 = vpop.eup %3320 }
 0x8ea   : > { %v1666_v44 = vmul.f32 %v3321_v47, %v3317_v30  ;;  %v3256_v47 = vld [vmem:[%s3912_s30 + $0x30] sm:$0xff]  }
 0x8ec   : > { %v1668_v49 = vpack.c.bf16 %v1666_v44, %v1666_v44  ;;  %v3257_v44 = vld [vmem:[%s3912_s30 + $0x38] sm:$0xff]   ;;  %s4388_s30 = scalar_lea.vmem %s4327_s4, %s3922_s17 }
 0x8ee   : > { %3079 = vmatmul.mubr.msk.bf16.vlgmr.msra.gmra.mrb[28].mxu0 %vm1084_vm3, %v1668_v49 }
 0x8ef   : > { %3089 = vmatpush3.bf16.msra.mxu0 %v3254_v48  ;;  %3092 = vmatprep.mubr.msk.bf16.mxu0 %vm3581_vm0, %v3580_v5 }
 0x8f0   : > { %3090 = vmatprep.subr.bf16.mxu0 %v3580_v5 }
 0x8f3   : > { %3091 = vmatpush3.bf16.msra.mxu0 %v3255_v55 }
 0x8f4   : > { %3102 = vmatprep.subr.bf16.mxu0 %v3580_v5 }
 0x928   : > { %v1760_v50 = vpop.f32.mrb[28].mxu1 }
 0x929   : > { %v3086_v52 = vpop.f32.mrb[29].mxu1 }
 0x92a   : > { %v1763_v53 = vpop.f32.mrb[30].mxu1 }
 0x92b   : > { %v3087_v54 = vpop.f32.mrb[31].mxu1 }
 0x9ba   : > { %v1869_v56 = vpop.f32.mrb[32].mxu1 }
 0x9bb   : > { %v1925_v57 = vmul.f32 0.17677669, %v1869_v56  ;;  %v3100_v58 = vpop.f32.mrb[33].mxu1 }
 0x9bc   : > { %v1872_v59 = vpop.f32.mrb[34].mxu1 }
 0x9bd   : > { %v3101_v62 = vpop.f32.mrb[35].mxu1  ;;  %v1927_v63 = vsel %vm1084_vm3, %v1925_v57, -inf }
 0x9be   : > { %1928 = vmax.xlane.f32.xlu0 %v1927_v63 }
 0x9c1   : > { %v1712_v1 = vpop.f32.mrb[28].mxu0 }
 0x9c2   : > { %v1766_v2 = vpack.c.bf16 %v1760_v50, %v1712_v1  ;;  %v3080_v3 = vpop.f32.mrb[29].mxu0 }
 0x9c3   : > { %v1715_v6 = vpop.f32.mrb[30].mxu0 }
 0x9c4   : > { %v3081_v8 = vpop.f32.mrb[31].mxu0  ;;  %3093 = vmatmul.mubr.msk.bf16.vlgmr.msra.gmra.mrb[32].mxu0 %vm989_vm1, %v1766_v2 }
 0x9c5   : > { %3103 = vmatpush3.bf16.xpose.msra.mxu0 %v1883_v7  ;;  %3104 = vmatprep.mubr.msk.bf16.mxu0 %vm3581_vm0, %v3580_v5  ;;  %v3258_v7 = vld [vmem:[%s3914_s25] ss:$8 sps:$4 sm:$0xff]   ;;  %v3260_v8 = vld [vmem:[%s3914_s25 + $0x4] ss:$8 sps:$4 sm:$0xff]  }
 0x9c6   : > { %3114 = vmatprep.subr.bf16.mxu0 %v3580_v5 }
 0x9cc   : > { %3105 = vmatmul.mubr.msk.bf16.vlgmr.msra.gmra.mrb[36].mxu0 %vm989_vm1, %v1876_v9  ;;  %v3263_v9 = vld [vmem:[%s3914_s25 + $0x14] ss:$8 sps:$4 sm:$0xff]  }
 0x9cd   : > { %3116 = vmatprep.mubr.msk.bf16.mxu0 %vm3581_vm0, %v3580_v5 }
 0xa4b   : > { %v1929_v10 = vpop.xlane.xlu0 %1928 }
 0xa4c   : > { %v1933_v11 = vsub.f32 %v1925_v57, %v1929_v10  ;;  %v3261_v10 = vld [vmem:[%s3914_s25 + $0x10] ss:$8 sps:$4 sm:$0xff]  }
 0xa4e   : > { %v1935_v12 = vmul.f32 1.442695, %v1933_v11 }
 0xa50   : > { %3322 = vpow2.f32 %v1935_v12 }
 0xa5a   : > { %v3323_v13 = vpop.eup %3322 }
 0xa5b   : > { %v1939_v15 = vsel %vm1084_vm3, %v3323_v13, 0.0 }
 0xa5c   : > { %1940 = vadd.xlane.f32.xlu0 %v1939_v15 }
 0xa97   : > { %v1816_v43 = vpop.f32.mrb[32].mxu0 }
 0xa98   : > { %v1823_v45 = vadd.f32 %v1816_v43, %v4151_v14  ;;  %v3094_v17 = vpop.f32.mrb[33].mxu0 }
 0xa99   : > { %v1819_v51 = vpop.f32.mrb[34].mxu0  ;;  %v3266_v17 = vld [vmem:[%s3914_s25 + $0x24] ss:$8 sps:$4 sm:$0xff]  }
 0xa9a   : > { %v1824_v18 = vadd.f32 %v1819_v51, %v4153_v16  ;;  %v3095_v19 = vpop.f32.mrb[35].mxu0  ;;  %v3264_v51 = vld [vmem:[%s3914_s25 + $0x20] ss:$8 sps:$4 sm:$0xff]  }
 0xa9b   : > { %v3267_v19 = vld [vmem:[%s3914_s25 + $0x30] ss:$8 sps:$4 sm:$0xff]  }
 0xa9f   : > { %v1919_v20 = vpop.f32.mrb[36].mxu0 }
 0xaa0   : > { %v1926_v21 = vmul.f32 0.17677669, %v1919_v20  ;;  %v3106_v22 = vpop.f32.mrb[37].mxu0  ;;  %v3272_v20 = vld [vmem:[%s3914_s25 + $0x44] ss:$8 sps:$4 sm:$0xff]  }
 0xaa1   : > { %v1922_v23 = vpop.f32.mrb[38].mxu0  ;;  %v3275_v22 = vld [vmem:[%s3914_s25 + $0x54] ss:$8 sps:$4 sm:$0xff]  }
 0xaa2   : > { %v3107_v24 = vpop.f32.mrb[39].mxu0  ;;  %v1930_v27 = vsel %vm1084_vm3, %v1926_v21, -inf  ;;  %v3273_v23 = vld [vmem:[%s3914_s25 + $0x50] ss:$8 sps:$4 sm:$0xff]  }
 0xaa3   : > { %1931 = vmax.xlane.f32.xlu1 %v1930_v27  ;;  %v3276_v24 = vld [vmem:[%s3914_s25 + $0x60] ss:$8 sps:$4 sm:$0xff]   ;;  %v3278_v27 = vld [vmem:[%s3914_s25 + $0x64] ss:$8 sps:$4 sm:$0xff]  }
 0xab4   : > { %1999 = vrot.lane.b32.xlu1 %v4047_v61, %s3584_s16 }
 0xae9   : > { %v1941_v35 = vpop.xlane.xlu0 %1940 }
 0xb30   : > { %v1932_v28 = vpop.xlane.xlu1 %1931 }
 0xb31   : > { %v1934_v29 = vsub.f32 %v1926_v21, %v1932_v28  ;;  %v3270_v21 = vld [vmem:[%s3914_s25 + $0x40] ss:$8 sps:$4 sm:$0xff]   ;;  %v3281_v28 = vld [vmem:[%s3914_s25 + $0x74] ss:$8 sps:$4 sm:$0xff]  }
 0xb33   : > { %v1937_v30 = vmul.f32 1.442695, %v1934_v29  ;;  %v3279_v29 = vld [vmem:[%s3914_s25 + $0x70] ss:$8 sps:$4 sm:$0xff]  }
 0xb34   : > { %v2000_v14 = vpop.permute.xlu1 %1999 }
 0xb35   : > { %3324 = vpow2.f32 %v1937_v30  ;;  %v2005_v31 = vsel %vm1112_vm2, %v2000_v14, 0 }
 0xb36   : > { %3115 = vmatpush3.bf16.msra.mxu0 %v2005_v31  ;;  %3326 = vrcp.f32 %v1941_v35 }
 0xb37   : > { %2267 = vmatprep.subr.bf16.mxu0 %v3260_v8 }
 0xb3f   : > { %v3325_v16 = vpop.eup %3324 }
 0xb40   : > { %v1942_v34 = vsel %vm1084_vm3, %v3325_v16, 0.0  ;;  %v3327_v37 = vpop.eup %3326 }
 0xb41   : > { %1943 = vadd.xlane.f32.xlu0 %v1942_v34  ;;  %v1947_v38 = vmul.f32 %v3327_v37, %v3323_v13 }
 0xb43   : > { %v1949_v41 = vpack.c.bf16 %v1947_v38, %v1947_v38 }
 0xb57   : > { %1951 = vrot.lane.b32.xlu0 %v4045_v60, %s3584_s16 }
 0xbce   : > { %v1944_v61 = vpop.xlane.xlu0 %1943 }
 0xbcf   : > { %3328 = vrcp.f32 %v1944_v61  ;;  %v2860_v61 = vld [vmem:[%s4389_s27] ss:$0 sm:$0xff] }
 0xbd2   : > { %v1952_v39 = vpop.permute.xlu0 %1951 }
 0xbd3   : > { %v1957_v40 = vsel %vm1112_vm2, %v1952_v39, 0 }
 0xbd4   : > { %3109 = vmatpush3.bf16.msra.mxu1 %v1957_v40 }
 0xbd5   : > { %3120 = vmatprep.subr.bf16.mxu1 %v3580_v5 }
 0xbd7   : > { %3111 = vmatmul.mubr.msk.bf16.vlgmr.msra.gmra.mrb[36].mxu1 %vm1084_vm3, %v1949_v41 }
 0xbd8   : > { %3124 = vmatprep.mubr.msk.bf16.mxu1 %vm3581_vm0, %v3580_v5  ;;  %3121 = vmatpush3.bf16.msra.mxu1 %v3256_v47 }
 0xbd9   : > { %v3329_v60 = vpop.eup %3328  ;;  %3122 = vmatprep.subr.bf16.mxu1 %v3580_v5  ;;  %v2859_v5 = vld [vmem:[%s4388_s30] ss:$0 sm:$0xff] }
 0xbda   : > { %v1948_v42 = vmul.f32 %v3329_v60, %v3325_v16  ;;  %v2861_v60 = vld [vmem:[%s4390_s7] ss:$0 sm:$0xff] }
 0xbdc   : > { %v1950_v46 = vpack.c.bf16 %v1948_v42, %v1948_v42  ;;  %3123 = vmatpush3.bf16.msra.mxu1 %v3257_v44 }
 0xbde   : > { %3117 = vmatmul.mubr.msk.bf16.vlgmr.msra.gmra.mrb[40].mxu0 %vm1084_vm3, %v1950_v46 }
 0xbdf   : > { %2299 = vmatprep.mubr.bf16.mxu0 %v3579_v4  ;;  %2268 = vmatpush1.bf16.msra.mxu0 %v3258_v7 }
 0xbe0   : > { %2269 = vmatprep.subr.bf16.mxu0 %v3263_v9 }
 0xbe3   : > { %2270 = vmatpush1.bf16.msra.mxu0 %v3261_v10 }
 0xbe4   : > { %2271 = vmatprep.subr.bf16.mxu0 %v3266_v17 }
 0xbe7   : > { %2272 = vmatpush1.bf16.msra.mxu0 %v3264_v51 }
 0xcaa   : > { %v1993_v48 = vpop.f32.mrb[36].mxu1 }
 0xcab   : > { %v3112_v49 = vpop.f32.mrb[37].mxu1 }
 0xcac   : > { %v1996_v50 = vpop.f32.mrb[38].mxu1  ;;  %v3283_v49 = vld [vmem:[%s3960_s10] sm:$0xff]  }
 0xcad   : > { %v3113_v52 = vpop.f32.mrb[39].mxu1  ;;  %v3284_v50 = vld [vmem:[%s3960_s10 + $0x48] sm:$0xff]  }
 0xcae   : > { %v3285_v52 = vld [vmem:[%s3960_s10 + $0x8] sm:$0xff]  }
 0xcb1   : > { %v2041_v53 = vpop.f32.mrb[40].mxu0 }
 0xcb2   : > { %v2047_v54 = vpack.c.bf16 %v2041_v53, %v1993_v48  ;;  %v3118_v55 = vpop.f32.mrb[41].mxu0  ;;  %v3282_v48 = vld [vmem:[%s3960_s10 + $0x40] sm:$0xff]   ;;  %v3286_v53 = vld [vmem:[%s3960_s10 + $0x50] sm:$0xff]  }
 0xcb3   : > { %v2044_v56 = vpop.f32.mrb[42].mxu0  ;;  %2958 = vmatprep.subr.bf16.mxu1 %v3282_v48  ;;  %v3288_v55 = vld [vmem:[%s3960_s10 + $0x58] sm:$0xff]  }
 0xcb4   : > { %v3119_v57 = vpop.f32.mrb[43].mxu0  ;;  %3125 = vmatmul.mubr.msk.bf16.vlgmr.msra.gmra.mrb[40].mxu1 %vm989_vm1, %v2047_v54  ;;  %v3287_v54 = vld [vmem:[%s3960_s10 + $0x10] sm:$0xff]   ;;  %v3289_v56 = vld [vmem:[%s3960_s10 + $0x18] sm:$0xff]  }
 0xcb5   : > { %2959 = vmatpush3.bf16.msra.mxu1 %v3283_v49  ;;  %v3290_v57 = vld [vmem:[%s3960_s10 + $0x60] sm:$0xff]  }
 0xcb6   : > { %2960 = vmatprep.subr.bf16.mxu1 %v3284_v50 }
 0xcb9   : > { %2961 = vmatpush3.bf16.msra.mxu1 %v3285_v52 }
 0xcba   : > { %2962 = vmatprep.subr.bf16.mxu1 %v3286_v53  ;;  %v2878_v53 = vld [vmem:[%s687_s29] ss:$0 sm:$0xff] }
 0xcbd   : > { %2963 = vmatpush3.bf16.msra.mxu1 %v3287_v54 }
 0xcbe   : > { %2964 = vmatprep.subr.bf16.mxu1 %v3288_v55 }
 0xcc1   : > { %2965 = vmatpush3.bf16.msra.mxu1 %v3289_v56 }
 0xcc2   : > { %2966 = vmatprep.subr.bf16.mxu1 %v3290_v57 }
 0xd87   : > { %v2097_v4 = vpop.f32.mrb[40].mxu1 }
 0xd88   : > { %v2104_v58 = vadd.f32 %v2097_v4, %v1823_v45  ;;  %v3126_v59 = vpop.f32.mrb[41].mxu1  ;;  %v3291_v4 = vld [vmem:[%s3960_s10 + $0x20] sm:$0xff]  }
 0xd89   : > { %v2100_v62 = vpop.f32.mrb[42].mxu1  ;;  %2967 = vmatpush3.bf16.msra.mxu1 %v3291_v4  ;;  %v3294_v59 = vld [vmem:[%s3960_s10 + $0x70] sm:$0xff]  }
 0xd8a   : > { %v2113_v63 = vadd.f32 %v2859_v5, %v2104_v58  ;;  %v2105_v0 = vadd.f32 %v2100_v62, %v1824_v18  ;;  %v3127_v1 = vpop.f32.mrb[43].mxu1  ;;  %v3269_v18 = vld [vmem:[%s3914_s25 + $0x34] ss:$8 sps:$4 sm:$0xff]   ;;  %v3293_v58 = vld [vmem:[%s3960_s10 + $0x28] sm:$0xff]  }
 0xd8b   : > { %2273 = vmatprep.subr.bf16.mxu0 %v3269_v18  ;;  %v3295_v62 = vld [vmem:[%s3960_s10 + $0x30] sm:$0xff]   ;;  %v2175_v1 = vld [vmem:[%s3946_s0] sm:$0x3] }
 0xd8c   : > { %v2114_v2 = vadd.f32 %v2859_v5, %v2105_v0  ;;  %v2115_v3 = vadd.f32 %v2113_v63, %v3990_v25  ;;  %2274 = vmatpush1.bf16.msra.mxu0 %v3267_v19  ;;  %v3292_v5 = vld [vmem:[%s3960_s10 + $0x68] sm:$0xff]   ;;  %v3296_v63 = vld [vmem:[%s3960_s10 + $0x78] sm:$0xff]  }
 0xd8d   : > { %2275 = vmatprep.subr.bf16.mxu0 %v3272_v20  ;;  %2968 = vmatprep.subr.bf16.mxu1 %v3292_v5  ;;  %v3297_v0 = vld [vmem:[%s3960_s10 + $0x38] sm:$0xff]  }
 0xd8e   : > { %2119 = vadd.xlane.f32.xlu1 %v2115_v3  ;;  %v2116_v6 = vadd.f32 %v2114_v2, %v3992_v26  ;;  %2969 = vmatpush3.bf16.msra.mxu1 %v3293_v58  ;;  %v2180_v2 = vrot.slane %v2175_v1, %v742_v36 }
 0xd8f   : > { %2970 = vmatprep.subr.bf16.mxu1 %v3294_v59 }
 0xd90   : > { %2121 = vadd.xlane.f32.xlu0 %v2116_v6  ;;  %2276 = vmatpush1.bf16.msra.mxu0 %v3270_v21 }
 0xd91   : > { %2277 = vmatprep.subr.bf16.mxu0 %v3275_v22 }
 0xd92   : > { %2971 = vmatpush3.bf16.msra.mxu1 %v3295_v62 }
 0xd93   : > { %2972 = vmatprep.subr.bf16.mxu1 %v3296_v63 }
 0xd94   : > { %2278 = vmatpush1.bf16.msra.mxu0 %v3273_v23 }
 0xd95   : > { %2279 = vmatprep.subr.bf16.mxu0 %v3278_v27 }
 0xd96   : > { %2973 = vmatpush3.bf16.msra.mxu1 %v3297_v0 }
 0xd98   : > { %2280 = vmatpush1.bf16.msra.mxu0 %v3276_v24 }
 0xd99   : > { %2281 = vmatprep.subr.bf16.mxu0 %v3281_v28 }
 0xd9c   : > { %2282 = vmatpush1.bf16.msra.mxu0 %v3279_v29 }
 0xe1b   : > { %v2120_v11 = vpop.xlane.xlu1 %2119 }
 0xe1c   : > { %v2124_v12 = vmul.f32 0.0078125, %v2120_v11 }
 0xe1d   : > { %v2122_v13 = vpop.xlane.xlu0 %2121 }
 0xe1e   : > { %v2126_v25 = vsub.f32 %v2115_v3, %v2124_v12  ;;  %v2125_v26 = vmul.f32 0.0078125, %v2122_v13  ;;  %v2184_v3 = vrot.slane %v2175_v1, %v746_v33 }
 0xe20   : > { %v2127_v15 = vsub.f32 %v2116_v6, %v2125_v26  ;;  %v2128_v43 = vmul.f32 %v2126_v25, %v2126_v25 }
 0xe22   : > { %2130 = vadd.xlane.f32.xlu0 %v2128_v43  ;;  %v2129_v45 = vmul.f32 %v2127_v15, %v2127_v15 }
 0xe24   : > { %2132 = vadd.xlane.f32.xlu1 %v2129_v45 }
 0xeaf   : > { %v2131_v30 = vpop.xlane.xlu0 %2130 }
 0xeb0   : > { %v2134_v14 = vmul.f32 0.0078125, %v2131_v30 }
 0xeb1   : > { %v2133_v31 = vpop.xlane.xlu1 %2132 }
 0xeb2   : > { %v2136_v16 = vadd.f32 1e-12, %v2134_v14  ;;  %v2135_v34 = vmul.f32 0.0078125, %v2133_v31 }
 0xeb4   : > { %3330 = vrsqrt.f32 %v2136_v16  ;;  %v2137_v35 = vadd.f32 1e-12, %v2135_v34 }
 0xeb6   : > { %3332 = vrsqrt.f32 %v2137_v35 }
 0xebe   : > { %v3331_v37 = vpop.eup %3330 }
 0xebf   : > { %v2140_v38 = vmul.f32 %v3331_v37, %v2126_v25 }
 0xec0   : > { %v3333_v39 = vpop.eup %3332 }
 0xec1   : > { %v2141_v40 = vmul.f32 %v3333_v39, %v2127_v15  ;;  %v2148_v41 = vmul.f32 %v2860_v61, %v2140_v38 }
 0xec3   : > { %v2149_v42 = vmul.f32 %v2860_v61, %v2141_v40  ;;  %v4242_v46 = vadd.f32 %v2861_v60, %v2148_v41 }
 0xec5   : > { %v4244_v47 = vadd.f32 %v2861_v60, %v2149_v42 }
 0xec7   : > { %v2158_v44 = vpack.c.bf16 %v4244_v47, %v4242_v46 }
 0xec9   : > { %2300 = vmatmul.mubr.bf16.vlgmr.msra.gmra.mrb[44].mxu0 %v2158_v44 }
 0xf9c   : > { %v2301_v6 = vpop.f32.mrb[44].mxu0 }
 0xf9d   : > { %v2302_v7 = vadd.f32 %v2301_v6, %v2180_v2  ;;  %v2303_v8 = vpop.f32.mrb[45].mxu0 }
 0xf9e   : > { %v2304_v9 = vadd.f32 %v2303_v8, %v2184_v3  ;;  %v2305_v10 = vpop.f32.mrb[46].mxu0 }
 0xf9f   : > { %v2314_v11 = vmul.f32 0.044715, %v2302_v7  ;;  %v2306_v12 = vadd.f32 %v2305_v10, %v2180_v2  ;;  %v2307_v13 = vpop.f32.mrb[47].mxu0  ;;  %v2310_v37 = vmul.f32 0.5, %v2302_v7 }
 0xfa0   : > { %v2315_v25 = vmul.f32 0.044715, %v2304_v9  ;;  %v2308_v26 = vadd.f32 %v2307_v13, %v2184_v3  ;;  %v2311_v39 = vmul.f32 0.5, %v2304_v9 }
 0xfa1   : > { %v2318_v15 = vmul.f32 %v2314_v11, %v2302_v7  ;;  %v2316_v43 = vmul.f32 0.044715, %v2306_v12  ;;  %v2312_v61 = vmul.f32 0.5, %v2306_v12 }
 0xfa2   : > { %v2319_v45 = vmul.f32 %v2315_v25, %v2304_v9  ;;  %v2317_v17 = vmul.f32 0.044715, %v2308_v26  ;;  %v2313_v40 = vmul.f32 0.5, %v2308_v26  ;;  %v2895_v25 = vld [vmem:[%s690_s11] ss:$0 sm:$0xff] }
 0xfa3   : > { %v2322_v51 = vmul.f32 %v2318_v15, %v2302_v7  ;;  %v2320_v18 = vmul.f32 %v2316_v43, %v2306_v12  ;;  %v2896_v43 = vld [vmem:[%s693_s22] ss:$0 sm:$0xff] }
 0xfa4   : > { %v2323_v36 = vmul.f32 %v2319_v45, %v2304_v9  ;;  %v2321_v19 = vmul.f32 %v2317_v17, %v2308_v26 }
 0xfa5   : > { %v2326_v32 = vadd.f32 %v2322_v51, %v2302_v7  ;;  %v2324_v33 = vmul.f32 %v2320_v18, %v2306_v12 }
 0xfa6   : > { %v2325_v20 = vmul.f32 %v2321_v19, %v2308_v26  ;;  %v2327_v21 = vadd.f32 %v2323_v36, %v2304_v9 }
 0xfa7   : > { %v2330_v22 = vmul.f32 0.7978846, %v2326_v32  ;;  %v2328_v23 = vadd.f32 %v2324_v33, %v2306_v12 }
 0xfa8   : > { %v2329_v24 = vadd.f32 %v2325_v20, %v2308_v26  ;;  %v2331_v27 = vmul.f32 0.7978846, %v2327_v21 }
 0xfa9   : > { %3334 = vtanh.f32 %v2330_v22  ;;  %v2332_v28 = vmul.f32 0.7978846, %v2328_v23 }
 0xfaa   : > { %v2333_v29 = vmul.f32 0.7978846, %v2329_v24  ;;  %3336 = vtanh.f32 %v2331_v27 }
 0xfab   : > { %3338 = vtanh.f32 %v2332_v28 }
 0xfac   : > { %3340 = vtanh.f32 %v2333_v29 }
 0xfb3   : > { %v3335_v30 = vpop.eup %3334 }
 0xfb4   : > { %v3337_v14 = vpop.eup %3336  ;;  %v2338_v31 = vadd.f32 1.0, %v3335_v30 }
 0xfb5   : > { %v3339_v16 = vpop.eup %3338  ;;  %v2339_v34 = vadd.f32 1.0, %v3337_v14 }
 0xfb6   : > { %v3341_v35 = vpop.eup %3340  ;;  %v2340_v38 = vadd.f32 1.0, %v3339_v16  ;;  %v2342_v60 = vmul.f32 %v2338_v31, %v2310_v37 }
 0xfb7   : > { %v2341_v41 = vadd.f32 1.0, %v3341_v35  ;;  %v2343_v44 = vmul.f32 %v2339_v34, %v2311_v39 }
 0xfb8   : > { %v2344_v42 = vmul.f32 %v2340_v38, %v2312_v61 }
 0xfb9   : > { %v2345_v48 = vmul.f32 %v2341_v41, %v2313_v40 }
 0xfba   : > { %v2346_v49 = vpack.c.bf16 %v2344_v42, %v2342_v60 }
 0xfbb   : > { %v2347_v50 = vpack.c.bf16 %v2345_v48, %v2343_v44 }
 0xfbd   : > { %2515 = vmatprep.mubr.bf16.mxu1 %v2347_v50 }
 0xfbe   : > { %2516 = vmatmul.mubr.bf16.vlgmr.msra.gmra.mrb[44].mxu1 %v2346_v49 }
0x1091   : > { %v2974_v52 = vpop.f32.mrb[44].mxu1 }
0x1092   : > { %v2975_v54 = vpop.f32.mrb[45].mxu1 }
0x1093   : > { %v2976_v55 = vadd.f32 %v2975_v54, %v2974_v52  ;;  %v2977_v56 = vpop.f32.mrb[46].mxu1 }
0x1094   : > { %v2978_v57 = vpop.f32.mrb[47].mxu1 }
0x1095   : > { %v2518_v4 = vadd.f32 %v2976_v55, %v2878_v53  ;;  %v2979_v5 = vadd.f32 %v2978_v57, %v2977_v56 }
0x1097   : > { %v2521_v58 = vadd.f32 %v2979_v5, %v2878_v53  ;;  %v2524_v59 = vadd.f32 %v2518_v4, %v4242_v46 }
0x1099   : > { %2528 = vadd.xlane.f32.xlu0 %v2524_v59  ;;  %v2525_v62 = vadd.f32 %v2521_v58, %v4244_v47 }
0x109b   : > { %2530 = vadd.xlane.f32.xlu1 %v2525_v62 }
0x1126   : > { %v2529_v63 = vpop.xlane.xlu0 %2528 }
0x1127   : > { %v2532_v0 = vmul.f32 0.0078125, %v2529_v63 }
0x1128   : > { %v2531_v1 = vpop.xlane.xlu1 %2530 }
0x1129   : > { %v2534_v2 = vsub.f32 %v2524_v59, %v2532_v0  ;;  %v2533_v3 = vmul.f32 0.0078125, %v2531_v1 }
0x112b   : > { %v2535_v6 = vsub.f32 %v2525_v62, %v2533_v3  ;;  %v2536_v7 = vmul.f32 %v2534_v2, %v2534_v2 }
0x112d   : > { %2538 = vadd.xlane.f32.xlu0 %v2536_v7  ;;  %v2537_v8 = vmul.f32 %v2535_v6, %v2535_v6 }
0x112f   : > { %2540 = vadd.xlane.f32.xlu1 %v2537_v8 }
0x11ba   : > { %v2539_v9 = vpop.xlane.xlu0 %2538 }
0x11bb   : > { %v2542_v10 = vmul.f32 0.0078125, %v2539_v9 }
0x11bc   : > { %v2541_v11 = vpop.xlane.xlu1 %2540 }
0x11bd   : > { %v2544_v46 = vadd.f32 1e-12, %v2542_v10  ;;  %v2543_v12 = vmul.f32 0.0078125, %v2541_v11 }
0x11bf   : > { %3342 = vrsqrt.f32 %v2544_v46  ;;  %v2545_v47 = vadd.f32 1e-12, %v2543_v12 }
0x11c1   : > { %3344 = vrsqrt.f32 %v2545_v47 }
0x11c9   : > { %v3343_v13 = vpop.eup %3342 }
0x11ca   : > { %v2548_v26 = vmul.f32 %v3343_v13, %v2534_v2 }
0x11cb   : > { %v3345_v15 = vpop.eup %3344 }
0x11cc   : > { %v2556_v45 = vmul.f32 %v2895_v25, %v2548_v26  ;;  %v2549_v17 = vmul.f32 %v3345_v15, %v2535_v6  ;;  %2571 = sbr.rel (%p2897_p11) target bundleno = 4563 (0x11d3), region = 100 }
0x11ce   : > { %v2564_v51 = vadd.f32 %v2896_v43, %v2556_v45  ;;  %v2557_v18 = vmul.f32 %v2895_v25, %v2549_v17 }
0x11d0   : > { %2566 = vst [vmem:[#allocation2] sm:$0xff] %v2564_v51  ;;  %v2565_v36 = vadd.f32 %v2896_v43, %v2557_v18  ;;  %2572 = vst [vmem:[#allocation12] sm:$0xff] (!%p2897_p11), %v2564_v51 }
0x11d2   : > { %2567 = vst [vmem:[#allocation2 + $0x8] sm:$0xff] %v2565_v36  ;;  %2573 = vst [vmem:[#allocation12 + $0x8] sm:$0xff] (!%p2897_p11), %v2565_v36 }
0x11d3 PF: > { %p3168_p8 = scmp.eq.s32.totalorder %s3794_s15, 1  ;;  %s3585_s11 = smov [#allocation12]  }
0x11d4   : > { %s2580_s10 = sshll.u32 %s3585_s11, 4  ;;  %s2581_s10 = int_to_ptr.vmem [resolvable:$true] %s2580_s10 }
0x11d5   : > { %s3494_s17 = scalar_lea.vmem %s2581_s10, 256  ;;  %p3501_p10 = scmp.lt.s32.totalorder %s2581_s10, %s2581_s10 }
0x11d6   : > { %p3495_p6 = scmp.ne.s32.totalorder %s2581_s10, %s3494_s17  ;;  %p3502_p1 = scmp.lt.s32.totalorder %s3494_s17, %s3494_s17 }
0x11d8   : > { %p3496_p7 = pnand %p3495_p6, %p3168_p8  ;;  %p3503_p13 = por %p3502_p1, %p3501_p10 }
0x11da   : > { %p3497_p2 = pneg %p3496_p7 }
0x11dc   : > { %p3504_p12 = pnand %p3503_p13, %p3497_p2 }
0x11de   : > { %3507 = shalt.err (!%p3504_p12)
}
0x11df   : > { %s4394_s9 = sld [smem:[#allocation29_spill]] }
0x11e5   : > { %s3508_s16 = scalar_lea.hbm %s4394_s9, 256 }
0x11e6   : > { %p3509_p0 = scmp.ne.s32.totalorder %s4394_s9, %s3508_s16  ;;  %p3514_p5 = scmp.lt.u32.totalorder %s3508_s16, %s4394_s9 }
0x11e8   : > { %p3510_p9 = pnand %p3509_p0, %p3168_p8 }
0x11ea   : > { %p3511_p3 = pneg %p3510_p9 }
0x11ec   : > { %p3516_p4 = pnand %p3514_p5, %p3511_p3 }
0x11ee   : > { %3519 = shalt.err (!%p3516_p4)
}
0x11ef   : > { %s3586_s18 = smov 128   ;;  %s3587_s27 = smov 8  }
0x11f0   : > { %3145 = dma.vmem_to_hbm [thread:$0]  (%p3168_p8), %s2581_s10, 256, %s4394_s9, [#allocation5], %s3586_s18, %s3586_s18, %s3587_s27  }
0x11f1   : > { %3549 = dma.done.wait (%p3168_p8), [#allocation5], 256  }
0x11f2   : > { %3551 = vsyncadd (%p3168_p8), [#allocation5], 4294967040 }
0x11f3 PF: > { %s4395_s28 = sld [smem:[#allocation18_spill]]  ;;  %s4396_s7 = sld [smem:[#allocation17_spill]] }
0x11f4   : > { %s4397_s27 = sld [smem:[#allocation19_spill]]  ;;  %s4398_s25 = smov %s3558_s26 }
0x11f9   : > { %p28_p11 = scmp.ge.s32.totalorder %s4395_s28, 4   ;;  %s4399_s26 = smov %s4396_s7 }
0x11fb   :  { %30 = sbr.rel (!%p28_p11) target bundleno = 18 (0x12), region = 181 }
0x1202   :  { %2596 = vsyncpa [#allocation4], 1 }
0x1203   :  { %2598 = vsyncpa [#allocation4 + $0x1], 1 }
0x1204   :  { %2599 = vsyncpa [#allocation7], 1 }
0x1205   :  { %2601 = vsyncpa [#allocation7 + $0x1], 1 }
0x1206   :  { %2602 = vsyncpa [#allocation10], 1 }
0x1207   :  { %2604 = vsyncpa [#allocation10 + $0x1], 1 }
0x1208   :  { %2605 = vsyncpa [#allocation5], 1 }
0x1209   :  { %2607 = vsyncpa [#allocation5 + $0x1], 1 }

</bundles_post_ra>
